<compile_context>
chip_gen: v7x
topology: tpu7x:2x2x1
jax: 0.10.0
libtpu: 0.0.40
codegen_flags: <defaults>
</compile_context>

<pallas_src>
from functools import partial

import jax
import jax.numpy as jnp
from jax.experimental import pallas as pl
from jax.experimental.pallas import tpu as pltpu

LANE = 128                      # lane padding for all feature dims
_VMEM_LIMIT = 32 * 1024 * 1024  # explicit scoped-VMEM override (v5e default 16 MiB)


def _round_up(v, m):
    return ((v + m - 1) // m) * m


def _pad2d(a, rows, cols, dtype):
    out = jnp.zeros((rows, cols), dtype)
    return out.at[: a.shape[0], : a.shape[1]].set(a.astype(dtype))


def _pad_and_tile(n):
    """Node padding + square A-tile size (>= 2 row tiles where possible)."""
    if n > 2048:
        tile = 512
    elif n > 512:
        tile = 256
    else:
        tile = 128
    return _round_up(n, tile), tile


# ---------------------------------------------------------------------------
# Kernels
# ---------------------------------------------------------------------------
def _gcn_kernel(a_ref, x_ref, w_ref, b_ref, o_ref, acc_ref):
    # h1[i] = relu( sum_k A[i,k] @ (X[k] @ W) + b ), projection fused in K-loop.
    k = pl.program_id(1)

    @pl.when(k == 0)
    def _():
        acc_ref[...] = jnp.zeros_like(acc_ref)

    xw = jnp.dot(x_ref[...], w_ref[...], preferred_element_type=jnp.float32)
    acc_ref[...] += jnp.dot(a_ref[...], xw.astype(jnp.bfloat16),
                            preferred_element_type=jnp.float32)

    @pl.when(k == pl.num_programs(1) - 1)
    def _():
        o_ref[...] = jnp.maximum(acc_ref[...] + b_ref[...], 0.0
                                 ).astype(o_ref.dtype)


def gcn_propagate(a, x, w, b, *, tile, out_dtype=jnp.bfloat16):
    n_p = a.shape[0]
    f = x.shape[1]
    nt = n_p // tile
    cost = pl.CostEstimate(
        flops=int(2 * n_p * n_p * f + 2 * nt * n_p * f * f),
        transcendentals=0,
        bytes_accessed=int(a.size * a.dtype.itemsize
                           + nt * x.size * x.dtype.itemsize
                           + n_p * f * jnp.dtype(out_dtype).itemsize),
    )
    return pl.pallas_call(
        _gcn_kernel,
        out_shape=jax.ShapeDtypeStruct((n_p, f), out_dtype),
        grid_spec=pltpu.PrefetchScalarGridSpec(
            num_scalar_prefetch=0,
            grid=(nt, nt),
            in_specs=[pl.BlockSpec((tile, tile), lambda i, k: (i, k)),
                      pl.BlockSpec((tile, f), lambda i, k: (k, 0)),
                      pl.BlockSpec((f, f), lambda i, k: (0, 0)),
                      pl.BlockSpec((1, f), lambda i, k: (0, 0))],
            out_specs=pl.BlockSpec((tile, f), lambda i, k: (i, 0)),
            scratch_shapes=[pltpu.VMEM((tile, f), jnp.float32)],
        ),
        compiler_params=pltpu.CompilerParams(
            dimension_semantics=("parallel", "arbitrary"),
            vmem_limit_bytes=_VMEM_LIMIT),
        cost_estimate=cost,
    )(a, x, w, b)


def _edge_gcn_kernel(a_ref, h_ref, wa_ref, ea_ref, we_ref, o_ref, acc_ref):
    # h2[i] = relu( sum_k A_add[i,k] @ (h1[k] @ Wa)  +  EA_aug[i] @ W_eff_aug )
    k = pl.program_id(1)

    @pl.when(k == 0)
    def _():
        acc_ref[...] = jnp.zeros_like(acc_ref)

    hw = jnp.dot(h_ref[...], wa_ref[...], preferred_element_type=jnp.float32)
    acc_ref[...] += jnp.dot(a_ref[...], hw.astype(jnp.bfloat16),
                            preferred_element_type=jnp.float32)

    @pl.when(k == pl.num_programs(1) - 1)
    def _():
        c = jnp.dot(ea_ref[...], we_ref[...],
                    preferred_element_type=jnp.float32)
        o_ref[...] = jnp.maximum(acc_ref[...] + c, 0.0).astype(o_ref.dtype)


def edge_gcn_propagate(a_add, h1, wa, ea_aug, w_eff_aug, *, tile,
                       out_dtype=jnp.bfloat16):
    n_p = a_add.shape[0]
    f = h1.shape[1]
    nt = n_p // tile
    cost = pl.CostEstimate(
        flops=int(2 * n_p * n_p * f + 2 * nt * n_p * f * f + 2 * n_p * f * f),
        transcendentals=0,
        bytes_accessed=int(a_add.size * a_add.dtype.itemsize
                           + nt * h1.size * h1.dtype.itemsize
                           + ea_aug.size * ea_aug.dtype.itemsize
                           + n_p * f * jnp.dtype(out_dtype).itemsize),
    )
    return pl.pallas_call(
        _edge_gcn_kernel,
        out_shape=jax.ShapeDtypeStruct((n_p, f), out_dtype),
        grid_spec=pltpu.PrefetchScalarGridSpec(
            num_scalar_prefetch=0,
            grid=(nt, nt),
            in_specs=[pl.BlockSpec((tile, tile), lambda i, k: (i, k)),
                      pl.BlockSpec((tile, f), lambda i, k: (k, 0)),
                      pl.BlockSpec((f, f), lambda i, k: (0, 0)),
                      # (i, 0): resident across the K sweep, fetched once/row tile
                      pl.BlockSpec((tile, f), lambda i, k: (i, 0)),
                      pl.BlockSpec((f, f), lambda i, k: (0, 0))],
            out_specs=pl.BlockSpec((tile, f), lambda i, k: (i, 0)),
            scratch_shapes=[pltpu.VMEM((tile, f), jnp.float32)],
        ),
        compiler_params=pltpu.CompilerParams(
            dimension_semantics=("parallel", "arbitrary"),
            vmem_limit_bytes=_VMEM_LIMIT),
        cost_estimate=cost,
    )(a_add, h1, wa, ea_aug, w_eff_aug)


def _pool_head_kernel(pool_ref, h_ref, wo_ref, bo_ref, o_ref, acc_ref):
    # pooled = Pool @ h2 (reduction over node tiles); out = pooled @ Wo + bo (f32)
    k = pl.program_id(0)

    @pl.when(k == 0)
    def _():
        acc_ref[...] = jnp.zeros_like(acc_ref)

    acc_ref[...] += jnp.dot(pool_ref[...], h_ref[...],
                            preferred_element_type=jnp.float32)

    @pl.when(k == pl.num_programs(0) - 1)
    def _():
        o_ref[...] = (jnp.dot(acc_ref[...], wo_ref[...],
                              preferred_element_type=jnp.float32)
                      + bo_ref[...]).astype(o_ref.dtype)


def pool_head(pool, h, wo, bo):
    g, n_p = pool.shape
    f = h.shape[1]
    do = wo.shape[1]
    tk = n_p if n_p <= 2048 else 512    # n_p > 2048 is padded to a 512 multiple
    return pl.pallas_call(
        _pool_head_kernel,
        out_shape=jax.ShapeDtypeStruct((g, do), jnp.float32),
        grid_spec=pltpu.PrefetchScalarGridSpec(
            num_scalar_prefetch=0,
            grid=(n_p // tk,),
            in_specs=[pl.BlockSpec((g, tk), lambda k: (0, k)),
                      pl.BlockSpec((tk, f), lambda k: (k, 0)),
                      pl.BlockSpec((f, do), lambda k: (0, 0)),
                      pl.BlockSpec((1, do), lambda k: (0, 0))],
            out_specs=pl.BlockSpec((g, do), lambda k: (0, 0)),
            scratch_shapes=[pltpu.VMEM((g, f), jnp.float32)],
        ),
        compiler_params=pltpu.CompilerParams(
            dimension_semantics=("arbitrary",),
            vmem_limit_bytes=_VMEM_LIMIT),
    )(pool, h, wo, bo)


# ---------------------------------------------------------------------------
# Forward pass (per-forward data prep + kernel pipeline)
# ---------------------------------------------------------------------------
@partial(jax.jit, static_argnames=("out_dim", "tile"))
def graph_encoder_forward(x, edge_attr, edge_dst, a_norm_p, a_add_p, pool_p,
                          deg_dst, params, *, out_dim, tile):
    n = x.shape[0]
    n_p = a_norm_p.shape[0]
    d_e = edge_attr.shape[1]
    assert d_e + 1 <= LANE
    bf, f32 = jnp.bfloat16, jnp.float32

    # Per-forward data: node features + per-node edge-attr aggregate (O(E*d_e)).
    x_p = _pad2d(x, n_p, LANE, bf)
    agg_ea = jnp.zeros((n, d_e), f32).at[edge_dst].add(edge_attr.astype(f32))

    # Weights: pad to full 128 lanes (bf16 for MXU, final Linear kept f32).
    wg = _pad2d(params["w_gcn"],   LANE, LANE, bf)
    wa = _pad2d(params["w_lin_a"], LANE, LANE, bf)
    wo = _pad2d(params["w_out"],   LANE, LANE, f32)
    bg = _pad2d(params["b_gcn"],   1, LANE, f32)
    bo = _pad2d(params["b_out"],   1, LANE, f32)

    # Edge-message fold in f32:  (ea We + be) Wb + bl == ea (We Wb) + (be Wb + bl).
    w_eff = params["w_edges"].astype(f32) @ params["w_lin_b"].astype(f32)
    b_eff = (params["b_edges"].astype(f32) @ params["w_lin_b"].astype(f32)
             + params["b_lin"].astype(f32))
    d_h = w_eff.shape[1]
    # Augment with an extra column (deg_dst) / extra row (b_eff) so the per-node
    # edge contribution is a single matmul: agg_aug @ w_aug = agg@W_eff + deg*b_eff.
    w_aug = (jnp.zeros((LANE, LANE), f32)
             .at[:d_e, :d_h].set(w_eff)
             .at[d_e, :d_h].set(b_eff[0])).astype(bf)
    agg_aug = (jnp.zeros((n_p, LANE), f32)
               .at[:n, :d_e].set(agg_ea)
               .at[:n, d_e].set(deg_dst)).astype(bf)

    # Stage 1: h1 = relu(A_norm @ (X @ Wg) + bg)   (projection fused in-kernel)
    h1 = gcn_propagate(a_norm_p, x_p, wg, bg, tile=tile)
    # Padded rows of h1 equal relu(b_gcn); harmless since A_add / Pool have
    # all-zero columns for padded indices — never read padded rows directly.

    # Stage 2: h2 = relu(A_add @ (h1 @ Wa) + agg_aug @ W_aug)
    h2 = edge_gcn_propagate(a_add_p, h1, wa, agg_aug, w_aug, tile=tile)

    # Stage 3: out = (Pool @ h2) @ Wo + bo
    out = pool_head(pool_p, h2, wo, bo)
    return out[:, :out_dim]


# ---------------------------------------------------------------------------
# Host-side graph-operator construction (static per graph; padding/casting
# hoisted here so the per-forward path never touches O(N^2) pad/convert ops).
# ---------------------------------------------------------------------------
def build_graph_operators(edge_index, batch, n_nodes, n_graphs):
    # TODO(synk): for very large graphs replace the dense operator matrices by
    # scalar-prefetched edge indices (PrefetchScalarGridSpec) + DMA gather /
    # segment-sum, dropping the O(N^2) operator traffic to O(E*d_h).
    f32 = jnp.float32
    row, col = edge_index[0], edge_index[1]          # src, dst

    # GCN normalization with self loops (PyG GCNConv default semantics).
    loop = jnp.arange(n_nodes)
    row_sl = jnp.concatenate([row, loop])
    col_sl = jnp.concatenate([col, loop])
    deg = jnp.zeros((n_nodes,), f32).at[col_sl].add(1.0)
    dinv = jnp.where(deg > 0, 1.0 / jnp.sqrt(deg), 0.0)
    norm = dinv[row_sl] * dinv[col_sl]
    a_norm = jnp.zeros((n_nodes, n_nodes), f32).at[col_sl, row_sl].add(norm)

    n_edges = row.shape[0]
    gsrc = jnp.zeros((n_edges, n_nodes), f32).at[jnp.arange(n_edges), row].set(1.0)
    sdst = jnp.zeros((n_nodes, n_edges), f32).at[col, jnp.arange(n_edges)].add(1.0)
    a_add = sdst @ gsrc                              # fused scatter@gather (N, N)
    deg_dst = jnp.zeros((n_nodes,), f32).at[col].add(1.0)   # in-degree per node

    onehot = jnp.zeros((n_graphs, n_nodes), f32).at[batch, jnp.arange(n_nodes)].set(1.0)
    counts = jnp.maximum(onehot.sum(axis=1, keepdims=True), 1.0)
    pool = onehot / counts

    n_p, tile = _pad_and_tile(n_nodes)
    ops = {
        "a_norm_p": _pad2d(a_norm, n_p, n_p, jnp.bfloat16),
        "a_add_p":  _pad2d(a_add,  n_p, n_p, jnp.bfloat16),
        "pool_p":   _pad2d(pool,   n_graphs, n_p, jnp.bfloat16),
        "deg_dst":  deg_dst,
        "tile":     tile,
    }
    ref_ops = {"a_norm": a_norm, "gsrc": gsrc, "sdst": sdst, "pool": pool}
    return ops, ref_ops


def init_params(key, d_v, d_e, d_h, output_dim):
    ks = jax.random.split(key, 10)
    s = 0.1
    return {
        "w_gcn":   s * jax.random.normal(ks[0], (d_v, d_h), jnp.float32),
        "b_gcn":   s * jax.random.normal(ks[1], (1, d_h), jnp.float32),
        "w_edges": s * jax.random.normal(ks[2], (d_e, d_h), jnp.float32),
        "b_edges": s * jax.random.normal(ks[3], (1, d_h), jnp.float32),
        "w_lin_a": s * jax.random.normal(ks[4], (d_h, d_h), jnp.float32),
        "w_lin_b": s * jax.random.normal(ks[5], (d_h, d_h), jnp.float32),
        "b_lin":   s * jax.random.normal(ks[6], (1, d_h), jnp.float32),
        "w_out":   s * jax.random.normal(ks[7], (d_h, output_dim), jnp.float32),
        "b_out":   s * jax.random.normal(ks[8], (1, output_dim), jnp.float32),
    }


def reference_forward(x, a_norm, gsrc, sdst, pool, edge_attr, p):
    """Pure-JAX f32 reference of the original (unfused) module math."""
    h1 = jax.nn.relu(a_norm @ (x @ p["w_gcn"]) + p["b_gcn"])
    xj = gsrc @ h1
    ef = edge_attr @ p["w_edges"] + p["b_edges"]
    msg = xj @ p["w_lin_a"] + ef @ p["w_lin_b"] + p["b_lin"]
    h2 = jax.nn.relu(sdst @ msg)
    return (pool @ h2) @ p["w_out"] + p["b_out"]


if __name__ == "__main__":
    d_v, d_e, d_h, output_dim = 8, 4, 32, 16
    nodes_per_graph, n_graphs = 80, 2          # small, but large enough to
    n_nodes = nodes_per_graph * n_graphs       # exercise multi-step grids

    key = jax.random.PRNGKey(0)
    k_x, k_e, k_p = jax.random.split(key, 3)

    batch = jnp.concatenate([jnp.full((nodes_per_graph,), g, jnp.int32)
                             for g in range(n_graphs)])
    src_list, dst_list = [], []
    for g in range(n_graphs):
        base = g * nodes_per_graph
        for i in range(nodes_per_graph):
            a = base + i
            b = base + (i + 1) % nodes_per_graph
            src_list += [a, b]
            dst_list += [b, a]
    edge_index = jnp.array([src_list, dst_list], dtype=jnp.int32)   # (2, 320)

    x = jax.random.normal(k_x, (n_nodes, d_v), jnp.float32)
    edge_attr = jax.random.normal(k_e, (edge_index.shape[1], d_e), jnp.float32)
    # Note: EdgeGCN.message computes `dist = edge_attr[:, 0]` but never uses it.
    params = init_params(k_p, d_v, d_e, d_h, output_dim)

    ops, ref_ops = build_graph_operators(edge_index, batch, n_nodes, n_graphs)

    out = graph_encoder_forward(
        x, edge_attr, edge_index[1],
        ops["a_norm_p"], ops["a_add_p"], ops["pool_p"], ops["deg_dst"],
        params, out_dim=output_dim, tile=ops["tile"])
    out = jax.block_until_ready(out)

    ref = reference_forward(x, ref_ops["a_norm"], ref_ops["gsrc"],
                            ref_ops["sdst"], ref_ops["pool"], edge_attr, params)
    assert out.shape == (n_graphs, output_dim)
    max_err = float(jnp.max(jnp.abs(out - ref)))
    assert jnp.allclose(out, ref, atol=2e-2, rtol=2e-2), (
        f"Pallas kernel mismatch vs reference (max abs err {max_err})")

    print("KERNEL_OK")
</pallas_src>

<mosaic_0001>
module attributes {stable_mosaic.version = 11 : i64} {
  func.func @_gcn_kernel(%arg0: i32, %arg1: i32, %arg2: memref<128x128xbf16, #tpu.memory_space<vmem>>, %arg3: memref<128x128xbf16, #tpu.memory_space<vmem>>, %arg4: memref<128x128xbf16, #tpu.memory_space<vmem>>, %arg5: memref<1x128xf32, #tpu.memory_space<vmem>>, %arg6: memref<128x128xbf16, #tpu.memory_space<vmem>>, %arg7: memref<128x128xf32, #tpu.memory_space<vmem>>) attributes {dimension_semantics = [#tpu.dimension_semantics<parallel>, #tpu.dimension_semantics<arbitrary>], iteration_bounds = array<i64: 2, 2>, scalar_prefetch = 0 : i64, scratch_operands = 1 : i64, tpu.core_type = #tpu.core_type<tc>, window_params = [{transform_indices = @transform_0, window_bounds = array<i64: 128, 128>}, {transform_indices = @transform_1, window_bounds = array<i64: 128, 128>}, {pipeline_mode = #tpu.pipeline_mode<synchronous>, transform_indices = @transform_2, window_bounds = array<i64: 128, 128>}, {pipeline_mode = #tpu.pipeline_mode<synchronous>, transform_indices = @transform_3, window_bounds = array<i64: 1, 128>}, {transform_indices = @transform_4, window_bounds = array<i64: 128, 128>}]} {
    %c0_i32 = arith.constant 0 : i32
    %0 = arith.cmpi eq, %arg1, %c0_i32 : i32
    %1 = arith.extui %0 : i1 to i32
    %c0_i32_0 = arith.constant 0 : i32
    %2 = arith.cmpi ne, %1, %c0_i32_0 : i32
    scf.if %2 {
      %cst_12 = arith.constant 0.000000e+00 : f32
      %15 = vector.broadcast %cst_12 : f32 to vector<128x128xf32>
      %c0_13 = arith.constant 0 : index
      %c0_14 = arith.constant 0 : index
      %16 = vector.load %arg7[%c0_13, %c0_14] : memref<128x128xf32, #tpu.memory_space<vmem>>, vector<128x128xf32>
      tpu.vector_store %arg7[%c0_13, %c0_14], %15 {strides = array<i32>} : memref<128x128xf32, #tpu.memory_space<vmem>>, vector<128x128xf32>,
    } else {
    }
    %c0 = arith.constant 0 : index
    %c0_1 = arith.constant 0 : index
    %3 = vector.load %arg3[%c0, %c0_1] : memref<128x128xbf16, #tpu.memory_space<vmem>>, vector<128x128xbf16>
    %c0_2 = arith.constant 0 : index
    %c0_3 = arith.constant 0 : index
    %4 = vector.load %arg4[%c0_2, %c0_3] : memref<128x128xbf16, #tpu.memory_space<vmem>>, vector<128x128xbf16>
    %cst = arith.constant dense<0.000000e+00> : vector<128x128xf32>
    %5 = tpu.matmul %3, %4, %cst {dimension_numbers = #tpu.dot_dimension_numbers<[1], [0], [0], [1], [0, 0, 1, 1], [], []>} : vector<128x128xbf16>, vector<128x128xbf16>, vector<128x128xf32> -> vector<128x128xf32>
    %c0_4 = arith.constant 0 : index
    %c0_5 = arith.constant 0 : index
    %6 = vector.load %arg7[%c0_4, %c0_5] : memref<128x128xf32, #tpu.memory_space<vmem>>, vector<128x128xf32>
    %c0_6 = arith.constant 0 : index
    %c0_7 = arith.constant 0 : index
    %7 = vector.load %arg2[%c0_6, %c0_7] : memref<128x128xbf16, #tpu.memory_space<vmem>>, vector<128x128xbf16>
    %8 = arith.truncf %5 : vector<128x128xf32> to vector<128x128xbf16>
    %cst_8 = arith.constant dense<0.000000e+00> : vector<128x128xf32>
    %9 = tpu.matmul %7, %8, %cst_8 {dimension_numbers = #tpu.dot_dimension_numbers<[1], [0], [0], [1], [0, 0, 1, 1], [], []>} : vector<128x128xbf16>, vector<128x128xbf16>, vector<128x128xf32> -> vector<128x128xf32>
    %10 = arith.addf %6, %9 : vector<128x128xf32>
    %c0_9 = arith.constant 0 : index
    %c0_10 = arith.constant 0 : index
    %11 = vector.load %arg7[%c0_9, %c0_10] : memref<128x128xf32, #tpu.memory_space<vmem>>, vector<128x128xf32>
    tpu.vector_store %arg7[%c0_9, %c0_10], %10 {strides = array<i32>} : memref<128x128xf32, #tpu.memory_space<vmem>>, vector<128x128xf32>,
    %c1_i32 = arith.constant 1 : i32
    %12 = arith.cmpi eq, %arg1, %c1_i32 : i32
    %13 = arith.extui %12 : i1 to i32
    %c0_i32_11 = arith.constant 0 : i32
    %14 = arith.cmpi ne, %13, %c0_i32_11 : i32
    scf.if %14 {
      %c0_12 = arith.constant 0 : index
      %c0_13 = arith.constant 0 : index
      %15 = vector.load %arg7[%c0_12, %c0_13] : memref<128x128xf32, #tpu.memory_space<vmem>>, vector<128x128xf32>
      %c0_14 = arith.constant 0 : index
      %c0_15 = arith.constant 0 : index
      %16 = vector.load %arg5[%c0_14, %c0_15] : memref<1x128xf32, #tpu.memory_space<vmem>>, vector<1x128xf32>
      %17 = vector.broadcast %16 : vector<1x128xf32> to vector<128x128xf32>
      %18 = arith.addf %15, %17 : vector<128x128xf32>
      %cst_16 = arith.constant 0.000000e+00 : f32
      %19 = vector.broadcast %cst_16 : f32 to vector<128x128xf32>
      %20 = arith.maximumf %18, %19 : vector<128x128xf32>
      %21 = arith.truncf %20 : vector<128x128xf32> to vector<128x128xbf16>
      %c0_17 = arith.constant 0 : index
      %c0_18 = arith.constant 0 : index
      %22 = vector.load %arg6[%c0_17, %c0_18] : memref<128x128xbf16, #tpu.memory_space<vmem>>, vector<128x128xbf16>
      tpu.vector_store %arg6[%c0_17, %c0_18], %21 {strides = array<i32>} : memref<128x128xbf16, #tpu.memory_space<vmem>>, vector<128x128xbf16>,
    } else {
    }
    return
  }
  func.func @transform_0(%arg0: i32, %arg1: i32) -> (i32, i32) {
    %c0_i32 = arith.constant 0 : i32
    return %arg0, %arg1 : i32, i32
  }
  func.func @transform_1(%arg0: i32, %arg1: i32) -> (i32, i32) {
    %c0_i32 = arith.constant 0 : i32
    %c0_i32_0 = arith.constant 0 : i32
    return %arg1, %c0_i32 : i32, i32
  }
  func.func @transform_2(%arg0: i32, %arg1: i32) -> (i32, i32) {
    %c0_i32 = arith.constant 0 : i32
    %c0_i32_0 = arith.constant 0 : i32
    %c0_i32_1 = arith.constant 0 : i32
    return %c0_i32, %c0_i32_0 : i32, i32
  }
  func.func @transform_3(%arg0: i32, %arg1: i32) -> (i32, i32) {
    %c0_i32 = arith.constant 0 : i32
    %c0_i32_0 = arith.constant 0 : i32
    %c0_i32_1 = arith.constant 0 : i32
    return %c0_i32, %c0_i32_0 : i32, i32
  }
  func.func @transform_4(%arg0: i32, %arg1: i32) -> (i32, i32) {
    %c0_i32 = arith.constant 0 : i32
    %c0_i32_0 = arith.constant 0 : i32
    return %arg0, %c0_i32 : i32, i32
  }
}

module attributes {stable_mosaic.version = 11 : i64} {
  func.func @_edge_gcn_kernel(%arg0: i32, %arg1: i32, %arg2: memref<128x128xbf16, #tpu.memory_space<vmem>>, %arg3: memref<128x128xbf16, #tpu.memory_space<vmem>>, %arg4: memref<128x128xbf16, #tpu.memory_space<vmem>>, %arg5: memref<128x128xbf16, #tpu.memory_space<vmem>>, %arg6: memref<128x128xbf16, #tpu.memory_space<vmem>>, %arg7: memref<128x128xbf16, #tpu.memory_space<vmem>>, %arg8: memref<128x128xf32, #tpu.memory_space<vmem>>) attributes {dimension_semantics = [#tpu.dimension_semantics<parallel>, #tpu.dimension_semantics<arbitrary>], iteration_bounds = array<i64: 2, 2>, scalar_prefetch = 0 : i64, scratch_operands = 1 : i64, tpu.core_type = #tpu.core_type<tc>, window_params = [{transform_indices = @transform_0, window_bounds = array<i64: 128, 128>}, {transform_indices = @transform_1, window_bounds = array<i64: 128, 128>}, {pipeline_mode = #tpu.pipeline_mode<synchronous>, transform_indices = @transform_2, window_bounds = array<i64: 128, 128>}, {transform_indices = @transform_3, window_bounds = array<i64: 128, 128>}, {pipeline_mode = #tpu.pipeline_mode<synchronous>, transform_indices = @transform_4, window_bounds = array<i64: 128, 128>}, {transform_indices = @transform_5, window_bounds = array<i64: 128, 128>}]} {
    %c0_i32 = arith.constant 0 : i32
    %0 = arith.cmpi eq, %arg1, %c0_i32 : i32
    %1 = arith.extui %0 : i1 to i32
    %c0_i32_0 = arith.constant 0 : i32
    %2 = arith.cmpi ne, %1, %c0_i32_0 : i32
    scf.if %2 {
      %cst_12 = arith.constant 0.000000e+00 : f32
      %15 = vector.broadcast %cst_12 : f32 to vector<128x128xf32>
      %c0_13 = arith.constant 0 : index
      %c0_14 = arith.constant 0 : index
      %16 = vector.load %arg8[%c0_13, %c0_14] : memref<128x128xf32, #tpu.memory_space<vmem>>, vector<128x128xf32>
      tpu.vector_store %arg8[%c0_13, %c0_14], %15 {strides = array<i32>} : memref<128x128xf32, #tpu.memory_space<vmem>>, vector<128x128xf32>,
    } else {
    }
    %c0 = arith.constant 0 : index
    %c0_1 = arith.constant 0 : index
    %3 = vector.load %arg3[%c0, %c0_1] : memref<128x128xbf16, #tpu.memory_space<vmem>>, vector<128x128xbf16>
    %c0_2 = arith.constant 0 : index
    %c0_3 = arith.constant 0 : index
    %4 = vector.load %arg4[%c0_2, %c0_3] : memref<128x128xbf16, #tpu.memory_space<vmem>>, vector<128x128xbf16>
    %cst = arith.constant dense<0.000000e+00> : vector<128x128xf32>
    %5 = tpu.matmul %3, %4, %cst {dimension_numbers = #tpu.dot_dimension_numbers<[1], [0], [0], [1], [0, 0, 1, 1], [], []>} : vector<128x128xbf16>, vector<128x128xbf16>, vector<128x128xf32> -> vector<128x128xf32>
    %c0_4 = arith.constant 0 : index
    %c0_5 = arith.constant 0 : index
    %6 = vector.load %arg8[%c0_4, %c0_5] : memref<128x128xf32, #tpu.memory_space<vmem>>, vector<128x128xf32>
    %c0_6 = arith.constant 0 : index
    %c0_7 = arith.constant 0 : index
    %7 = vector.load %arg2[%c0_6, %c0_7] : memref<128x128xbf16, #tpu.memory_space<vmem>>, vector<128x128xbf16>
    %8 = arith.truncf %5 : vector<128x128xf32> to vector<128x128xbf16>
    %cst_8 = arith.constant dense<0.000000e+00> : vector<128x128xf32>
    %9 = tpu.matmul %7, %8, %cst_8 {dimension_numbers = #tpu.dot_dimension_numbers<[1], [0], [0], [1], [0, 0, 1, 1], [], []>} : vector<128x128xbf16>, vector<128x128xbf16>, vector<128x128xf32> -> vector<128x128xf32>
    %10 = arith.addf %6, %9 : vector<128x128xf32>
    %c0_9 = arith.constant 0 : index
    %c0_10 = arith.constant 0 : index
    %11 = vector.load %arg8[%c0_9, %c0_10] : memref<128x128xf32, #tpu.memory_space<vmem>>, vector<128x128xf32>
    tpu.vector_store %arg8[%c0_9, %c0_10], %10 {strides = array<i32>} : memref<128x128xf32, #tpu.memory_space<vmem>>, vector<128x128xf32>,
    %c1_i32 = arith.constant 1 : i32
    %12 = arith.cmpi eq, %arg1, %c1_i32 : i32
    %13 = arith.extui %12 : i1 to i32
    %c0_i32_11 = arith.constant 0 : i32
    %14 = arith.cmpi ne, %13, %c0_i32_11 : i32
    scf.if %14 {
      %c0_12 = arith.constant 0 : index
      %c0_13 = arith.constant 0 : index
      %15 = vector.load %arg5[%c0_12, %c0_13] : memref<128x128xbf16, #tpu.memory_space<vmem>>, vector<128x128xbf16>
      %c0_14 = arith.constant 0 : index
      %c0_15 = arith.constant 0 : index
      %16 = vector.load %arg6[%c0_14, %c0_15] : memref<128x128xbf16, #tpu.memory_space<vmem>>, vector<128x128xbf16>
      %cst_16 = arith.constant dense<0.000000e+00> : vector<128x128xf32>
      %17 = tpu.matmul %15, %16, %cst_16 {dimension_numbers = #tpu.dot_dimension_numbers<[1], [0], [0], [1], [0, 0, 1, 1], [], []>} : vector<128x128xbf16>, vector<128x128xbf16>, vector<128x128xf32> -> vector<128x128xf32>
      %c0_17 = arith.constant 0 : index
      %c0_18 = arith.constant 0 : index
      %18 = vector.load %arg8[%c0_17, %c0_18] : memref<128x128xf32, #tpu.memory_space<vmem>>, vector<128x128xf32>
      %19 = arith.addf %18, %17 : vector<128x128xf32>
      %cst_19 = arith.constant 0.000000e+00 : f32
      %20 = vector.broadcast %cst_19 : f32 to vector<128x128xf32>
      %21 = arith.maximumf %19, %20 : vector<128x128xf32>
      %22 = arith.truncf %21 : vector<128x128xf32> to vector<128x128xbf16>
      %c0_20 = arith.constant 0 : index
      %c0_21 = arith.constant 0 : index
      %23 = vector.load %arg7[%c0_20, %c0_21] : memref<128x128xbf16, #tpu.memory_space<vmem>>, vector<128x128xbf16>
      tpu.vector_store %arg7[%c0_20, %c0_21], %22 {strides = array<i32>} : memref<128x128xbf16, #tpu.memory_space<vmem>>, vector<128x128xbf16>,
    } else {
    }
    return
  }
  func.func @transform_0(%arg0: i32, %arg1: i32) -> (i32, i32) {
    %c0_i32 = arith.constant 0 : i32
    return %arg0, %arg1 : i32, i32
  }
  func.func @transform_1(%arg0: i32, %arg1: i32) -> (i32, i32) {
    %c0_i32 = arith.constant 0 : i32
    %c0_i32_0 = arith.constant 0 : i32
    return %arg1, %c0_i32 : i32, i32
  }
  func.func @transform_2(%arg0: i32, %arg1: i32) -> (i32, i32) {
    %c0_i32 = arith.constant 0 : i32
    %c0_i32_0 = arith.constant 0 : i32
    %c0_i32_1 = arith.constant 0 : i32
    return %c0_i32, %c0_i32_0 : i32, i32
  }
  func.func @transform_3(%arg0: i32, %arg1: i32) -> (i32, i32) {
    %c0_i32 = arith.constant 0 : i32
    %c0_i32_0 = arith.constant 0 : i32
    return %arg0, %c0_i32 : i32, i32
  }
  func.func @transform_4(%arg0: i32, %arg1: i32) -> (i32, i32) {
    %c0_i32 = arith.constant 0 : i32
    %c0_i32_0 = arith.constant 0 : i32
    %c0_i32_1 = arith.constant 0 : i32
    return %c0_i32, %c0_i32_0 : i32, i32
  }
  func.func @transform_5(%arg0: i32, %arg1: i32) -> (i32, i32) {
    %c0_i32 = arith.constant 0 : i32
    %c0_i32_0 = arith.constant 0 : i32
    return %arg0, %c0_i32 : i32, i32
  }
}

module attributes {stable_mosaic.version = 11 : i64} {
  func.func @_pool_head_kernel(%arg0: i32, %arg1: memref<2x256xbf16, #tpu.memory_space<vmem>>, %arg2: memref<256x128xbf16, #tpu.memory_space<vmem>>, %arg3: memref<128x128xf32, #tpu.memory_space<vmem>>, %arg4: memref<1x128xf32, #tpu.memory_space<vmem>>, %arg5: memref<2x128xf32, #tpu.memory_space<vmem>>, %arg6: memref<2x128xf32, #tpu.memory_space<vmem>>) attributes {dimension_semantics = [#tpu.dimension_semantics<arbitrary>], iteration_bounds = array<i64: 1>, scalar_prefetch = 0 : i64, scratch_operands = 1 : i64, tpu.core_type = #tpu.core_type<tc>, window_params = [{transform_indices = @transform_0, window_bounds = array<i64: 2, 256>}, {transform_indices = @transform_1, window_bounds = array<i64: 256, 128>}, {pipeline_mode = #tpu.pipeline_mode<synchronous>, transform_indices = @transform_2, window_bounds = array<i64: 128, 128>}, {pipeline_mode = #tpu.pipeline_mode<synchronous>, transform_indices = @transform_3, window_bounds = array<i64: 1, 128>}, {pipeline_mode = #tpu.pipeline_mode<synchronous>, transform_indices = @transform_4, window_bounds = array<i64: 2, 128>}]} {
    %c0_i32 = arith.constant 0 : i32
    %0 = arith.cmpi eq, %arg0, %c0_i32 : i32
    %1 = arith.extui %0 : i1 to i32
    %c0_i32_0 = arith.constant 0 : i32
    %2 = arith.cmpi ne, %1, %c0_i32_0 : i32
    scf.if %2 {
      %cst_10 = arith.constant 0.000000e+00 : f32
      %12 = vector.broadcast %cst_10 : f32 to vector<2x128xf32>
      %c0_11 = arith.constant 0 : index
      %c0_12 = arith.constant 0 : index
      %13 = vector.load %arg6[%c0_11, %c0_12] : memref<2x128xf32, #tpu.memory_space<vmem>>, vector<2x128xf32>
      tpu.vector_store %arg6[%c0_11, %c0_12], %12 {strides = array<i32>} : memref<2x128xf32, #tpu.memory_space<vmem>>, vector<2x128xf32>,
    } else {
    }
    %c0 = arith.constant 0 : index
    %c0_1 = arith.constant 0 : index
    %3 = vector.load %arg6[%c0, %c0_1] : memref<2x128xf32, #tpu.memory_space<vmem>>, vector<2x128xf32>
    %c0_2 = arith.constant 0 : index
    %c0_3 = arith.constant 0 : index
    %4 = vector.load %arg1[%c0_2, %c0_3] : memref<2x256xbf16, #tpu.memory_space<vmem>>, vector<2x256xbf16>
    %c0_4 = arith.constant 0 : index
    %c0_5 = arith.constant 0 : index
    %5 = vector.load %arg2[%c0_4, %c0_5] : memref<256x128xbf16, #tpu.memory_space<vmem>>, vector<256x128xbf16>
    %cst = arith.constant dense<0.000000e+00> : vector<2x128xf32>
    %6 = tpu.matmul %4, %5, %cst {dimension_numbers = #tpu.dot_dimension_numbers<[1], [0], [0], [1], [0, 0, 1, 1], [], []>} : vector<2x256xbf16>, vector<256x128xbf16>, vector<2x128xf32> -> vector<2x128xf32>
    %7 = arith.addf %3, %6 : vector<2x128xf32>
    %c0_6 = arith.constant 0 : index
    %c0_7 = arith.constant 0 : index
    %8 = vector.load %arg6[%c0_6, %c0_7] : memref<2x128xf32, #tpu.memory_space<vmem>>, vector<2x128xf32>
    tpu.vector_store %arg6[%c0_6, %c0_7], %7 {strides = array<i32>} : memref<2x128xf32, #tpu.memory_space<vmem>>, vector<2x128xf32>,
    %c0_i32_8 = arith.constant 0 : i32
    %9 = arith.cmpi eq, %arg0, %c0_i32_8 : i32
    %10 = arith.extui %9 : i1 to i32
    %c0_i32_9 = arith.constant 0 : i32
    %11 = arith.cmpi ne, %10, %c0_i32_9 : i32
    scf.if %11 {
      %c0_10 = arith.constant 0 : index
      %c0_11 = arith.constant 0 : index
      %12 = vector.load %arg6[%c0_10, %c0_11] : memref<2x128xf32, #tpu.memory_space<vmem>>, vector<2x128xf32>
      %c0_12 = arith.constant 0 : index
      %c0_13 = arith.constant 0 : index
      %13 = vector.load %arg3[%c0_12, %c0_13] : memref<128x128xf32, #tpu.memory_space<vmem>>, vector<128x128xf32>
      %cst_14 = arith.constant dense<0.000000e+00> : vector<2x128xf32>
      %14 = tpu.matmul %12, %13, %cst_14 {dimension_numbers = #tpu.dot_dimension_numbers<[1], [0], [0], [1], [0, 0, 1, 1], [], []>} : vector<2x128xf32>, vector<128x128xf32>, vector<2x128xf32> -> vector<2x128xf32>
      %c0_15 = arith.constant 0 : index
      %c0_16 = arith.constant 0 : index
      %15 = vector.load %arg4[%c0_15, %c0_16] : memref<1x128xf32, #tpu.memory_space<vmem>>, vector<1x128xf32>
      %16 = vector.broadcast %15 : vector<1x128xf32> to vector<2x128xf32>
      %17 = arith.addf %14, %16 : vector<2x128xf32>
      %c0_17 = arith.constant 0 : index
      %c0_18 = arith.constant 0 : index
      %18 = vector.load %arg5[%c0_17, %c0_18] : memref<2x128xf32, #tpu.memory_space<vmem>>, vector<2x128xf32>
      tpu.vector_store %arg5[%c0_17, %c0_18], %17 {strides = array<i32>} : memref<2x128xf32, #tpu.memory_space<vmem>>, vector<2x128xf32>,
    } else {
    }
    return
  }
  func.func @transform_0(%arg0: i32) -> (i32, i32) {
    %c0_i32 = arith.constant 0 : i32
    %c0_i32_0 = arith.constant 0 : i32
    return %c0_i32, %arg0 : i32, i32
  }
  func.func @transform_1(%arg0: i32) -> (i32, i32) {
    %c0_i32 = arith.constant 0 : i32
    %c0_i32_0 = arith.constant 0 : i32
    return %arg0, %c0_i32 : i32, i32
  }
  func.func @transform_2(%arg0: i32) -> (i32, i32) {
    %c0_i32 = arith.constant 0 : i32
    %c0_i32_0 = arith.constant 0 : i32
    %c0_i32_1 = arith.constant 0 : i32
    return %c0_i32, %c0_i32_0 : i32, i32
  }
  func.func @transform_3(%arg0: i32) -> (i32, i32) {
    %c0_i32 = arith.constant 0 : i32
    %c0_i32_0 = arith.constant 0 : i32
    %c0_i32_1 = arith.constant 0 : i32
    return %c0_i32, %c0_i32_0 : i32, i32
  }
  func.func @transform_4(%arg0: i32) -> (i32, i32) {
    %c0_i32 = arith.constant 0 : i32
    %c0_i32_0 = arith.constant 0 : i32
    %c0_i32_1 = arith.constant 0 : i32
    return %c0_i32, %c0_i32_0 : i32, i32
  }
}

</mosaic_0001>

<bundles_post_ra>
// kernel: graph_encoder_forward.3
= control target key start
LH: loop header
LB: loop body
LE: loop exit
PB: predicated region body
PF: predicated region fallthrough
CT: control target
= control target key end

     0   :  { %s1412_s15 = smov 0   ;;  %s1414_s16 = smov 0   ;;  %s1581_s0 = inlined_call_operand.vmem [shape: bf16[256,256], index: 0, kind: input, shape index: {}]   ;;  %s1582_s1 = inlined_call_operand.vmem [shape: bf16[256,128], index: 1, kind: input, shape index: {}]   ;;  %s1583_s2 = inlined_call_operand.vmem [shape: bf16[128,128], index: 2, kind: input, shape index: {}]   ;;  %s1584_s3 = inlined_call_operand.vmem [shape: f32[1,128], index: 3, kind: input, shape index: {}]   ;;  %s1585_s4 = inlined_call_operand.vmem [shape: bf16[256,128], index: 4, kind: output, shape index: {}]  }
   0x1   :  { %s1416_s17 = smov 0   ;;  %s1418_s18 = smov 0  }
   0x2   :  { %s1420_s19 = smov 0   ;;  %s1422_s20 = smov 0  }
   0x3   :  { %s1424_s21 = smov 0  }
   0x4 LB: > { %s23_s22 = sadd.s32 1, %s1376_s19  ;;  %s26_s23 = sadd.s32 1, %s1380_s20  ;;  %s1384_s21 = sphi %s1424_s21, %s14_s21   ;;  %s1380_s20 = sphi %s1422_s20, %s1591_s20   ;;  %s1376_s19 = sphi %s1420_s19, %s1590_s19   ;;  %s1372_s18 = sphi %s1418_s18, %s1589_s18   ;;  %s1368_s17 = sphi %s1416_s17, %s1588_s17   ;;  %s1364_s16 = sphi %s1414_s16, %s1587_s16   ;;  %s1360_s15 = sphi %s1412_s15, %s1586_s15  }
   0x5   : > { %p24_p0 = scmp.ge.s32.totalorder %s23_s22, 2  ;;  %p42_p1 = scmp.ne.s32.totalorder %s1364_s16, %s1360_s15 }
   0x6   : > { %p43_p2 = scmp.eq.s32.totalorder %s1384_s21, 0  ;;  %s35_s27 = sadd.s32 1, %s1364_s16 }
   0x7   : > { %s1593_s22 = smov (%p24_p0, %s23_s22), 0  ;;  %s1595_s23 = smov (!%p24_p0, %s26_s23), %s1380_s20 }
   0x8   : > { %p44_p3 = por %p43_p2, %p42_p1  ;;  %p28_p4 = scmp.ge.s32.totalorder %s1595_s23, 2 }
   0x9   : > { %s31_s24 = ssub.s32 %s1376_s19, %s1593_s22  ;;  %p1033_p6 = scmp.ge.s32.totalorder %s1384_s21, 4 }
   0xa   : > { %s1597_s23 = smov (%p28_p4, %s1595_s23), 0 }
   0xb   : > { %s30_s25 = ssub.s32 %s1380_s20, %s1597_s23  ;;  %168 = sbr.rel (%p1033_p6) target bundleno = 34 (0x22), region = 24 }
   0xc   : > { %s32_s26 = sor.u32 %s31_s24, %s30_s25 }
   0xd   : > { %p33_p5 = scmp.eq.s32.totalorder %s32_s26, 0 }
   0xf   : > { %s1463_s28 = scalar_select %p33_p5, %s1364_s16, %s35_s27  }
  0x12   : > { %171 = sbr.rel (!%p44_p3) target bundleno = 34 (0x22), region = 28  ;;  %s173_s29 = sand.u32 (%p44_p3), 1, %s1364_s16  }
  0x13   : > { %s1089_s30 = sshll.u32 (%p44_p3), %s1380_s20, 5  ;;  %s1034_s5 = sshll.u32 (%p44_p3), %s173_s29, 6 }
  0x14   : > { %s178_s6 = sadd.s32 (%p44_p3), %s1376_s19, %s1089_s30  ;;  %s175_s11 = scalar_lea.vmem (%p44_p3), [#allocation3], %s1034_s5 }
  0x15   : > { %s1037_s7 = sshll.u32 (%p44_p3), %s178_s6, 2 }
  0x16   : > { %s1472_s10 = scalar_lea.vmem (%p44_p3), %s1581_s0, %s1037_s7 }
  0x17   : > { %v196_v0 = vld [vmem:[%s1472_s10] sm:$0xf] (%p44_p3)  ;;  %v198_v1 = vld [vmem:[%s1472_s10 + $0x8] sm:$0xf] (%p44_p3)  ;;  %v200_v2 = vld [vmem:[%s1472_s10 + $0x10] sm:$0xf] (%p44_p3) }
  0x18   : > { %197 = vst [vmem:[%s175_s11] sm:$0xf] (%p44_p3), %v196_v0  ;;  %199 = vst [vmem:[%s175_s11 + $0x4] sm:$0xf] (%p44_p3), %v198_v1  ;;  %v202_v3 = vld [vmem:[%s1472_s10 + $0x18] sm:$0xf] (%p44_p3) }
  0x19   : > { %201 = vst [vmem:[%s175_s11 + $0x8] sm:$0xf] %v200_v2  ;;  %v204_v4 = vld [vmem:[%s1472_s10 + $0x20] sm:$0xf]  ;;  %v206_v5 = vld [vmem:[%s1472_s10 + $0x28] sm:$0xf] }
  0x1a   : > { %203 = vst [vmem:[%s175_s11 + $0xc] sm:$0xf] %v202_v3  ;;  %205 = vst [vmem:[%s175_s11 + $0x10] sm:$0xf] %v204_v4  ;;  %v208_v6 = vld [vmem:[%s1472_s10 + $0x30] sm:$0xf] }
  0x1b   : > { %207 = vst [vmem:[%s175_s11 + $0x14] sm:$0xf] %v206_v5  ;;  %v210_v7 = vld [vmem:[%s1472_s10 + $0x38] sm:$0xf]  ;;  %v212_v8 = vld [vmem:[%s1472_s10 + $0x40] sm:$0xf] }
  0x1c   : > { %209 = vst [vmem:[%s175_s11 + $0x18] sm:$0xf] %v208_v6  ;;  %211 = vst [vmem:[%s175_s11 + $0x1c] sm:$0xf] %v210_v7  ;;  %v214_v9 = vld [vmem:[%s1472_s10 + $0x48] sm:$0xf] }
  0x1d   : > { %213 = vst [vmem:[%s175_s11 + $0x20] sm:$0xf] %v212_v8  ;;  %v216_v10 = vld [vmem:[%s1472_s10 + $0x50] sm:$0xf]  ;;  %v218_v11 = vld [vmem:[%s1472_s10 + $0x58] sm:$0xf] }
  0x1e   : > { %215 = vst [vmem:[%s175_s11 + $0x24] sm:$0xf] %v214_v9  ;;  %217 = vst [vmem:[%s175_s11 + $0x28] sm:$0xf] %v216_v10  ;;  %v220_v12 = vld [vmem:[%s1472_s10 + $0x60] sm:$0xf] }
  0x1f   : > { %219 = vst [vmem:[%s175_s11 + $0x2c] sm:$0xf] %v218_v11  ;;  %v222_v13 = vld [vmem:[%s1472_s10 + $0x68] sm:$0xf]  ;;  %v224_v14 = vld [vmem:[%s1472_s10 + $0x70] sm:$0xf] }
  0x20   : > { %221 = vst [vmem:[%s175_s11 + $0x30] sm:$0xf] %v220_v12  ;;  %223 = vst [vmem:[%s175_s11 + $0x34] sm:$0xf] %v222_v13  ;;  %v226_v15 = vld [vmem:[%s1472_s10 + $0x78] sm:$0xf] }
  0x21   : > { %225 = vst [vmem:[%s175_s11 + $0x38] sm:$0xf] %v224_v14  ;;  %227 = vst [vmem:[%s175_s11 + $0x3c] sm:$0xf] %v226_v15 }
  0x22 PF: > { %p1038_p7 = scmp.ge.s32.totalorder %s1384_s21, 1  ;;  %p290_p8 = scmp.lt.s32.totalorder %s1384_s21, 5 }
  0x24   : > { %p291_p9 = pnand %p1038_p7, %p290_p8 }
  0x25   : > { %s297_s12 = sand.u32 (!%p291_p9), 1, %s1360_s15   ;;  %s1040_s13 = sshll.u32 (!%p291_p9), %s1368_s17, 4 }
  0x26   : > { %294 = sbr.rel (%p291_p9) target bundleno = 593 (0x251), region = 73  ;;  %s1039_s14 = sshll.u32 (!%p291_p9), %s297_s12, 6 }
  0x27   : > { %p329_p10 = scmp.lt.s32.totalorder (!%p291_p9), %s1040_s13, 31  ;;  %s1042_s24 = sshll.u32 (!%p291_p9), %s1372_s18, 4 }
  0x28   : > { %p335_p11 = scmp.lt.s32.totalorder (!%p291_p9), %s1042_s24, 31  ;;  %s1505_s15 = scalar_lea.vmem (!%p291_p9), [#allocation3], %s1039_s14 }
  0x29   : > { %p1044_p12 = scmp.ne.s32.totalorder (!%p291_p9), %s1368_s17, 0 }
  0x2d   : > { %s1599_s13 = smov (!%p329_p10, %s1040_s13), 31  ;;  %s1601_s24 = smov (!%p335_p11, %s1042_s24), 31 }
  0x2e   : > { %s1041_s25 = sshll.u32 %s1599_s13, 2  ;;  %s1043_s30 = sshll.u32 %s1601_s24, 2  ;;  %v1386_v16 = vmov (!%p1044_p12), 0.0  }
  0x2f   : > { %s1498_s29 = scalar_lea.vmem %s1582_s1, %s1041_s25  ;;  %s1503_s7 = scalar_lea.vmem %s1585_s4, %s1043_s30  ;;  %345 = vst [vmem:[#allocation2] sm:$0xff] (!%p1044_p12), %v1386_v16  ;;  %346 = vst [vmem:[#allocation2 + $0x8] sm:$0xff] (!%p1044_p12), %v1386_v16 }
  0x30   : > { %344 = sbr.rel (%p1044_p12) target bundleno = 55 (0x37), region = 81  ;;  %347 = vst [vmem:[#allocation2 + $0x10] sm:$0xff] (!%p1044_p12), %v1386_v16  ;;  %348 = vst [vmem:[#allocation2 + $0x18] sm:$0xff] (!%p1044_p12), %v1386_v16 }
  0x31   : > { %349 = vst [vmem:[#allocation2 + $0x20] sm:$0xff] (!%p1044_p12), %v1386_v16  ;;  %350 = vst [vmem:[#allocation2 + $0x28] sm:$0xff] (!%p1044_p12), %v1386_v16 }
  0x32   : > { %351 = vst [vmem:[#allocation2 + $0x30] sm:$0xff] (!%p1044_p12), %v1386_v16  ;;  %352 = vst [vmem:[#allocation2 + $0x38] sm:$0xff] (!%p1044_p12), %v1386_v16 }
  0x33   : > { %353 = vst [vmem:[#allocation2 + $0x40] sm:$0xff] (!%p1044_p12), %v1386_v16  ;;  %354 = vst [vmem:[#allocation2 + $0x48] sm:$0xff] (!%p1044_p12), %v1386_v16 }
  0x34   : > { %355 = vst [vmem:[#allocation2 + $0x50] sm:$0xff] (!%p1044_p12), %v1386_v16  ;;  %356 = vst [vmem:[#allocation2 + $0x58] sm:$0xff] (!%p1044_p12), %v1386_v16 }
  0x35   : > { %357 = vst [vmem:[#allocation2 + $0x60] sm:$0xff] (!%p1044_p12), %v1386_v16  ;;  %358 = vst [vmem:[#allocation2 + $0x68] sm:$0xff] (!%p1044_p12), %v1386_v16 }
  0x36   : > { %359 = vst [vmem:[#allocation2 + $0x70] sm:$0xff] (!%p1044_p12), %v1386_v16  ;;  %360 = vst [vmem:[#allocation2 + $0x78] sm:$0xff] (!%p1044_p12), %v1386_v16 }
  0x37 PF: > { %v1306_v17 = vld [vmem:[%s1583_s2] sm:$0xff]   ;;  %v1307_v18 = vld [vmem:[%s1583_s2 + $0x8] sm:$0xff]   ;;  %v1308_v19 = vld [vmem:[%s1583_s2 + $0x10] sm:$0xff]   ;;  %p1069_p13 = scmp.ne.s32.totalorder %s1368_s17, 1 }
  0x38   : > { %1185 = vmatprep.subr.bf16.mxu0 %v1306_v17  ;;  %v1309_v20 = vld [vmem:[%s1583_s2 + $0x18] sm:$0xff]   ;;  %v1314_v21 = vld [vmem:[%s1498_s29] sm:$0xff]   ;;  %v1311_v23 = vld [vmem:[%s1583_s2 + $0x28] sm:$0xff]  }
  0x39   : > { %1186 = vmatpush3.bf16.msra.mxu0 %v1306_v17  ;;  %1201 = vmatprep.mubr.bf16.mxu0 %v1314_v21  ;;  %v1310_v22 = vld [vmem:[%s1583_s2 + $0x20] sm:$0xff]   ;;  %v1312_v24 = vld [vmem:[%s1583_s2 + $0x30] sm:$0xff]   ;;  %v1313_v25 = vld [vmem:[%s1583_s2 + $0x38] sm:$0xff]  }
  0x3a   : > { %1187 = vmatprep.subr.bf16.mxu0 %v1307_v18  ;;  %v1315_v26 = vld [vmem:[%s1498_s29 + $0x8] sm:$0xff]   ;;  %v1316_v27 = vld [vmem:[%s1498_s29 + $0x10] sm:$0xff]   ;;  %v1317_v28 = vld [vmem:[%s1498_s29 + $0x18] sm:$0xff]  }
  0x3b   : > { %v1318_v29 = vld [vmem:[%s1498_s29 + $0x20] sm:$0xff]   ;;  %v1319_v30 = vld [vmem:[%s1498_s29 + $0x28] sm:$0xff]   ;;  %v1320_v31 = vld [vmem:[%s1498_s29 + $0x30] sm:$0xff]  }
  0x3c   : > { %v1321_v32 = vld [vmem:[%s1498_s29 + $0x38] sm:$0xff]   ;;  %v1322_v33 = vld [vmem:[%s1505_s15] sm:$0xff]   ;;  %v1323_v58 = vld [vmem:[%s1505_s15 + $0x8] sm:$0xff]  }
  0x3d   : > { %1188 = vmatpush3.bf16.msra.mxu0 %v1307_v18  ;;  %1233 = vmatprep.mubr.bf16.mxu1 %v1322_v33  ;;  %v1324_v59 = vld [vmem:[%s1505_s15 + $0x10] sm:$0xff]   ;;  %v1325_v60 = vld [vmem:[%s1505_s15 + $0x18] sm:$0xff]   ;;  %v1326_v61 = vld [vmem:[%s1505_s15 + $0x20] sm:$0xff]  }
  0x3e   : > { %1189 = vmatprep.subr.bf16.mxu0 %v1308_v19  ;;  %v1327_v62 = vld [vmem:[%s1505_s15 + $0x28] sm:$0xff]   ;;  %v1328_v63 = vld [vmem:[%s1505_s15 + $0x30] sm:$0xff]   ;;  %v1329_v0 = vld [vmem:[%s1505_s15 + $0x38] sm:$0xff]  }
  0x3f   : > { %v588_v1 = vld [vmem:[#allocation2 + $0x10] sm:$0xff]  ;;  %v586_v2 = vld [vmem:[#allocation2] sm:$0xff]  ;;  %v589_v4 = vld [vmem:[#allocation2 + $0x18] sm:$0xff] }
  0x40   : > { %v587_v7 = vld [vmem:[#allocation2 + $0x8] sm:$0xff]  ;;  %v592_v13 = vld [vmem:[#allocation2 + $0x30] sm:$0xff]  ;;  %v590_v14 = vld [vmem:[#allocation2 + $0x20] sm:$0xff] }
  0x41   : > { %1190 = vmatpush3.bf16.msra.mxu0 %v1308_v19  ;;  %v593_v16 = vld [vmem:[#allocation2 + $0x38] sm:$0xff]  ;;  %v591_v19 = vld [vmem:[#allocation2 + $0x28] sm:$0xff] }
  0x42   : > { %1191 = vmatprep.subr.bf16.mxu0 %v1309_v20 }
  0x45   : > { %1192 = vmatpush3.bf16.msra.mxu0 %v1309_v20 }
  0x46   : > { %1193 = vmatprep.subr.bf16.mxu0 %v1310_v22 }
  0x49   : > { %1194 = vmatpush3.bf16.msra.mxu0 %v1310_v22 }
  0x4a   : > { %1195 = vmatprep.subr.bf16.mxu0 %v1311_v23 }
  0x4d   : > { %1196 = vmatpush3.bf16.msra.mxu0 %v1311_v23 }
  0x4e   : > { %1197 = vmatprep.subr.bf16.mxu0 %v1312_v24 }
  0x51   : > { %1198 = vmatpush3.bf16.msra.mxu0 %v1312_v24 }
  0x52   : > { %1199 = vmatprep.subr.bf16.mxu0 %v1313_v25 }
  0x55   : > { %1200 = vmatpush3.bf16.msra.mxu0 %v1313_v25  ;;  %v596_v25 = vld [vmem:[#allocation2 + $0x50] sm:$0xff] }
  0x58   : > { %1202 = vmatmul.mubr.bf16.vlgmr.msra.gmra.mrb[0].mxu0 %v1315_v26  ;;  %v594_v26 = vld [vmem:[#allocation2 + $0x40] sm:$0xff] }
  0x59   : > { %1205 = vmatprep.mubr.bf16.mxu0 %v1316_v27 }
  0x60   : > { %1206 = vmatmul.mubr.bf16.gmra.mrb[4].mxu0 %v1317_v28  ;;  %v597_v28 = vld [vmem:[#allocation2 + $0x58] sm:$0xff] }
  0x61   : > { %1209 = vmatprep.mubr.bf16.mxu0 %v1318_v29 }
  0x68   : > { %1210 = vmatmul.mubr.bf16.gmra.mrb[8].mxu0 %v1319_v30 }
  0x69   : > { %1213 = vmatprep.mubr.bf16.mxu0 %v1320_v31  ;;  %v595_v31 = vld [vmem:[#allocation2 + $0x48] sm:$0xff] }
  0x70   : > { %1214 = vmatmul.mubr.bf16.gmra.mrb[12].mxu0 %v1321_v32 }
 0x12b   : > { %v1203_v34 = vpop.f32.mrb[0].mxu0 }
 0x12c   : > { %v523_v35 = vpop.f32.mrb[1].mxu0 }
 0x12d   : > { %v1204_v36 = vpop.f32.mrb[2].mxu0 }
 0x12e   : > { %v619_v37 = vpack.c.bf16 %v1204_v36, %v1203_v34  ;;  %v526_v38 = vpop.f32.mrb[3].mxu0 }
 0x12f   : > { %v618_v39 = vpack.c.bf16 %v526_v38, %v523_v35  ;;  %v598_v38 = vld [vmem:[#allocation2 + $0x60] sm:$0xff] }
 0x131   : > { %1217 = vmatprep.subr.bf16.mxu1 %v618_v39 }
 0x132   : > { %1218 = vmatpush3.bf16.msra.mxu1 %v618_v39 }
 0x133   : > { %v1207_v40 = vpop.f32.mrb[4].mxu0  ;;  %1219 = vmatprep.subr.bf16.mxu1 %v619_v37 }
 0x134   : > { %v539_v41 = vpop.f32.mrb[5].mxu0 }
 0x135   : > { %v1208_v42 = vpop.f32.mrb[6].mxu0 }
 0x136   : > { %v621_v43 = vpack.c.bf16 %v1208_v42, %v1207_v40  ;;  %v542_v44 = vpop.f32.mrb[7].mxu0  ;;  %1220 = vmatpush3.bf16.msra.mxu1 %v619_v37  ;;  %v600_v37 = vld [vmem:[#allocation2 + $0x70] sm:$0xff]  ;;  %v601_v40 = vld [vmem:[#allocation2 + $0x78] sm:$0xff] }
 0x137   : > { %v620_v45 = vpack.c.bf16 %v542_v44, %v539_v41 }
 0x139   : > { %1221 = vmatprep.subr.bf16.mxu1 %v620_v45 }
 0x13a   : > { %1222 = vmatpush3.bf16.msra.mxu1 %v620_v45 }
 0x13b   : > { %v1211_v46 = vpop.f32.mrb[8].mxu0  ;;  %1223 = vmatprep.subr.bf16.mxu1 %v621_v43 }
 0x13c   : > { %v555_v47 = vpop.f32.mrb[9].mxu0 }
 0x13d   : > { %v1212_v48 = vpop.f32.mrb[10].mxu0 }
 0x13e   : > { %v623_v49 = vpack.c.bf16 %v1212_v48, %v1211_v46  ;;  %v558_v50 = vpop.f32.mrb[11].mxu0  ;;  %1224 = vmatpush3.bf16.msra.mxu1 %v621_v43  ;;  %v599_v43 = vld [vmem:[#allocation2 + $0x68] sm:$0xff] }
 0x13f   : > { %v622_v51 = vpack.c.bf16 %v558_v50, %v555_v47 }
 0x141   : > { %1225 = vmatprep.subr.bf16.mxu1 %v622_v51 }
 0x142   : > { %1226 = vmatpush3.bf16.msra.mxu1 %v622_v51  ;;  %v1070_v51 = vld [vmem:[%s1584_s3] ss:$0 sm:$0xff] (!%p1069_p13) }
 0x143   : > { %v1215_v52 = vpop.f32.mrb[12].mxu0  ;;  %1227 = vmatprep.subr.bf16.mxu1 %v623_v49 }
 0x144   : > { %v571_v53 = vpop.f32.mrb[13].mxu0 }
 0x145   : > { %v1216_v54 = vpop.f32.mrb[14].mxu0 }
 0x146   : > { %v625_v55 = vpack.c.bf16 %v1216_v54, %v1215_v52  ;;  %v574_v56 = vpop.f32.mrb[15].mxu0  ;;  %1228 = vmatpush3.bf16.msra.mxu1 %v623_v49 }
 0x147   : > { %v624_v57 = vpack.c.bf16 %v574_v56, %v571_v53 }
 0x149   : > { %1229 = vmatprep.subr.bf16.mxu1 %v624_v57 }
 0x14a   : > { %1230 = vmatpush3.bf16.msra.mxu1 %v624_v57 }
 0x14b   : > { %1231 = vmatprep.subr.bf16.mxu1 %v625_v55 }
 0x14e   : > { %1232 = vmatpush3.bf16.msra.mxu1 %v625_v55 }
 0x151   : > { %1234 = vmatmul.mubr.bf16.vlgmr.msra.gmra.mrb[0].mxu1 %v1323_v58 }
 0x152   : > { %1237 = vmatprep.mubr.bf16.mxu1 %v1324_v59 }
 0x159   : > { %1238 = vmatmul.mubr.bf16.gmra.mrb[4].mxu1 %v1325_v60 }
 0x15a   : > { %1241 = vmatprep.mubr.bf16.mxu1 %v1326_v61 }
 0x161   : > { %1242 = vmatmul.mubr.bf16.gmra.mrb[8].mxu1 %v1327_v62 }
 0x162   : > { %1245 = vmatprep.mubr.bf16.mxu1 %v1328_v63 }
 0x169   : > { %1246 = vmatmul.mubr.bf16.gmra.mrb[12].mxu1 %v1329_v0 }
 0x224   : > { %v1235_v3 = vpop.f32.mrb[0].mxu1 }
 0x225   : > { %v773_v5 = vadd.f32 %v1235_v3, %v588_v1  ;;  %v708_v6 = vpop.f32.mrb[1].mxu1 }
 0x226   : > { %v771_v8 = vadd.f32 %v708_v6, %v586_v2  ;;  %v1236_v9 = vpop.f32.mrb[2].mxu1 }
 0x227   : > { %789 = vst [vmem:[#allocation2 + $0x10] sm:$0xff] %v773_v5  ;;  %v774_v10 = vadd.f32 %v1236_v9, %v589_v4  ;;  %v711_v11 = vpop.f32.mrb[3].mxu1 }
 0x228   : > { %787 = vst [vmem:[#allocation2] sm:$0xff] %v771_v8  ;;  %v772_v12 = vadd.f32 %v711_v11, %v587_v7 }
 0x229   : > { %790 = vst [vmem:[#allocation2 + $0x18] sm:$0xff] %v774_v10 }
 0x22a   : > { %788 = vst [vmem:[#allocation2 + $0x8] sm:$0xff] %v772_v12 }
 0x22c   : > { %v1239_v15 = vpop.f32.mrb[4].mxu1 }
 0x22d   : > { %v777_v17 = vadd.f32 %v1239_v15, %v592_v13  ;;  %v724_v18 = vpop.f32.mrb[5].mxu1 }
 0x22e   : > { %v775_v20 = vadd.f32 %v724_v18, %v590_v14  ;;  %v1240_v21 = vpop.f32.mrb[6].mxu1  ;;  %v809_v54 = vld [vmem:[#allocation2 + $0x10] sm:$0xff] (!%p1069_p13) }
 0x22f   : > { %793 = vst [vmem:[#allocation2 + $0x30] sm:$0xff] %v777_v17  ;;  %v778_v22 = vadd.f32 %v1240_v21, %v593_v16  ;;  %v727_v23 = vpop.f32.mrb[7].mxu1  ;;  %v807_v49 = vld [vmem:[#allocation2] sm:$0xff] (!%p1069_p13)  ;;  %v832_v57 = vadd.f32 (!%p1069_p13), %v1070_v51, %v809_v54 }
 0x230   : > { %791 = vst [vmem:[#allocation2 + $0x20] sm:$0xff] %v775_v20  ;;  %v776_v24 = vadd.f32 %v727_v23, %v591_v19  ;;  %v830_v52 = vadd.f32 (!%p1069_p13), %v1070_v51, %v807_v49  ;;  %v810_v55 = vld [vmem:[#allocation2 + $0x18] sm:$0xff] (!%p1069_p13) }
 0x231   : > { %794 = vst [vmem:[#allocation2 + $0x38] sm:$0xff] %v778_v22  ;;  %v808_v50 = vld [vmem:[#allocation2 + $0x8] sm:$0xff] (!%p1069_p13)  ;;  %v833_v58 = vadd.f32 (!%p1069_p13), %v1070_v51, %v810_v55  ;;  %v848_v6 = vmax.f32 (!%p1069_p13), %v832_v57, 0.0 }
 0x232   : > { %792 = vst [vmem:[#allocation2 + $0x28] sm:$0xff] %v776_v24  ;;  %v831_v53 = vadd.f32 (!%p1069_p13), %v1070_v51, %v808_v50  ;;  %v846_v63 = vmax.f32 (!%p1069_p13), %v830_v52, 0.0 }
 0x233   : > { %v849_v7 = vmax.f32 (!%p1069_p13), %v833_v58, 0.0 }
 0x234   : > { %v1243_v27 = vpop.f32.mrb[8].mxu1  ;;  %v847_v0 = vmax.f32 (!%p1069_p13), %v831_v53, 0.0 }
 0x235   : > { %v781_v29 = vadd.f32 %v1243_v27, %v596_v25  ;;  %v740_v30 = vpop.f32.mrb[9].mxu1  ;;  %v1114_v17 = vpack.c.bf16 (!%p1069_p13), %v849_v7, %v848_v6 }
 0x236   : > { %v779_v32 = vadd.f32 %v740_v30, %v594_v26  ;;  %v1244_v33 = vpop.f32.mrb[10].mxu1  ;;  %v813_v61 = vld [vmem:[#allocation2 + $0x30] sm:$0xff] (!%p1069_p13)  ;;  %v1109_v12 = vpack.c.bf16 (!%p1069_p13), %v847_v0, %v846_v63 }
 0x237   : > { %797 = vst [vmem:[#allocation2 + $0x50] sm:$0xff] %v781_v29  ;;  %v782_v34 = vadd.f32 %v1244_v33, %v597_v28  ;;  %v743_v35 = vpop.f32.mrb[11].mxu1  ;;  %v811_v56 = vld [vmem:[#allocation2 + $0x20] sm:$0xff] (!%p1069_p13)  ;;  %v836_v2 = vadd.f32 (!%p1069_p13), %v1070_v51, %v813_v61  ;;  %1146 = vst [vmem:[%s1503_s7 + $0x8] sm:$0xff] (!%p1069_p13), %v1114_v17  }
 0x238   : > { %795 = vst [vmem:[#allocation2 + $0x40] sm:$0xff] %v779_v32  ;;  %v780_v36 = vadd.f32 %v743_v35, %v595_v31  ;;  %v834_v60 = vadd.f32 (!%p1069_p13), %v1070_v51, %v811_v56  ;;  %v814_v62 = vld [vmem:[#allocation2 + $0x38] sm:$0xff] (!%p1069_p13)  ;;  %1110 = vst [vmem:[%s1503_s7] sm:$0xff] (!%p1069_p13), %v1109_v12  }
 0x239   : > { %798 = vst [vmem:[#allocation2 + $0x58] sm:$0xff] %v782_v34  ;;  %v812_v59 = vld [vmem:[#allocation2 + $0x28] sm:$0xff] (!%p1069_p13)  ;;  %v837_v9 = vadd.f32 (!%p1069_p13), %v1070_v51, %v814_v62  ;;  %v852_v14 = vmax.f32 (!%p1069_p13), %v836_v2, 0.0 }
 0x23a   : > { %796 = vst [vmem:[#allocation2 + $0x48] sm:$0xff] %v780_v36  ;;  %v835_v1 = vadd.f32 (!%p1069_p13), %v1070_v51, %v812_v59  ;;  %v850_v8 = vmax.f32 (!%p1069_p13), %v834_v60, 0.0 }
 0x23b   : > { %v853_v18 = vmax.f32 (!%p1069_p13), %v837_v9, 0.0 }
 0x23c   : > { %v1247_v39 = vpop.f32.mrb[12].mxu1  ;;  %806 = sbr.rel (%p1069_p13) target bundleno = 593 (0x251), region = 85  ;;  %v851_v13 = vmax.f32 (!%p1069_p13), %v835_v1, 0.0 }
 0x23d   : > { %v785_v41 = vadd.f32 %v1247_v39, %v600_v37  ;;  %v756_v42 = vpop.f32.mrb[13].mxu1  ;;  %v1124_v27 = vpack.c.bf16 (!%p1069_p13), %v853_v18, %v852_v14 }
 0x23e   : > { %v783_v44 = vadd.f32 %v756_v42, %v598_v38  ;;  %v1248_v45 = vpop.f32.mrb[14].mxu1  ;;  %v817_v5 = vld [vmem:[#allocation2 + $0x50] sm:$0xff] (!%p1069_p13)  ;;  %v1119_v23 = vpack.c.bf16 (!%p1069_p13), %v851_v13, %v850_v8 }
 0x23f   : > { %801 = vst [vmem:[#allocation2 + $0x70] sm:$0xff] %v785_v41  ;;  %v786_v46 = vadd.f32 %v1248_v45, %v601_v40  ;;  %v759_v47 = vpop.f32.mrb[15].mxu1  ;;  %v815_v3 = vld [vmem:[#allocation2 + $0x40] sm:$0xff] (!%p1069_p13)  ;;  %v840_v20 = vadd.f32 (!%p1069_p13), %v1070_v51, %v817_v5  ;;  %1148 = vst [vmem:[%s1503_s7 + $0x18] sm:$0xff] (!%p1069_p13), %v1124_v27  }
 0x240   : > { %799 = vst [vmem:[#allocation2 + $0x60] sm:$0xff] %v783_v44  ;;  %v784_v48 = vadd.f32 %v759_v47, %v599_v43  ;;  %v818_v10 = vld [vmem:[#allocation2 + $0x58] sm:$0xff] (!%p1069_p13)  ;;  %v838_v15 = vadd.f32 (!%p1069_p13), %v1070_v51, %v815_v3  ;;  %1147 = vst [vmem:[%s1503_s7 + $0x10] sm:$0xff] (!%p1069_p13), %v1119_v23  }
 0x241   : > { %802 = vst [vmem:[#allocation2 + $0x78] sm:$0xff] %v786_v46  ;;  %v816_v4 = vld [vmem:[#allocation2 + $0x48] sm:$0xff] (!%p1069_p13)  ;;  %v841_v25 = vadd.f32 (!%p1069_p13), %v1070_v51, %v818_v10  ;;  %v856_v29 = vmax.f32 (!%p1069_p13), %v840_v20, 0.0 }
 0x242   : > { %800 = vst [vmem:[#allocation2 + $0x68] sm:$0xff] %v784_v48  ;;  %v839_v19 = vadd.f32 (!%p1069_p13), %v1070_v51, %v816_v4  ;;  %v854_v24 = vmax.f32 (!%p1069_p13), %v838_v15, 0.0 }
 0x243   : > { %v857_v31 = vmax.f32 %v841_v25, 0.0 }
 0x244   : > { %v855_v28 = vmax.f32 %v839_v19, 0.0 }
 0x245   : > { %v1134_v37 = vpack.c.bf16 %v857_v31, %v856_v29 }
 0x246   : > { %v821_v21 = vld [vmem:[#allocation2 + $0x70] sm:$0xff]  ;;  %v1129_v35 = vpack.c.bf16 %v855_v28, %v854_v24 }
 0x247   : > { %v819_v11 = vld [vmem:[#allocation2 + $0x60] sm:$0xff]  ;;  %v844_v33 = vadd.f32 %v1070_v51, %v821_v21  ;;  %1150 = vst [vmem:[%s1503_s7 + $0x28] sm:$0xff] %v1134_v37  }
 0x248   : > { %v822_v22 = vld [vmem:[#allocation2 + $0x78] sm:$0xff]  ;;  %v842_v26 = vadd.f32 %v1070_v51, %v819_v11  ;;  %1149 = vst [vmem:[%s1503_s7 + $0x20] sm:$0xff] %v1129_v35  }
 0x249   : > { %v820_v16 = vld [vmem:[#allocation2 + $0x68] sm:$0xff]  ;;  %v845_v34 = vadd.f32 %v1070_v51, %v822_v22  ;;  %v860_v38 = vmax.f32 %v844_v33, 0.0 }
 0x24a   : > { %v843_v30 = vadd.f32 %v1070_v51, %v820_v16  ;;  %v858_v32 = vmax.f32 %v842_v26, 0.0 }
 0x24b   : > { %v861_v39 = vmax.f32 %v845_v34, 0.0 }
 0x24c   : > { %v859_v36 = vmax.f32 %v843_v30, 0.0 }
 0x24d   : > { %v1144_v41 = vpack.c.bf16 %v861_v39, %v860_v38 }
 0x24e   : > { %v1139_v40 = vpack.c.bf16 %v859_v36, %v858_v32 }
 0x24f   : > { %1152 = vst [vmem:[%s1503_s7 + $0x38] sm:$0xff] %v1144_v41  }
 0x250   : > { %1151 = vst [vmem:[%s1503_s7 + $0x30] sm:$0xff] %v1139_v40  }
 0x251 PF: > { %s14_s21 = sadd.s32 1, %s1384_s21   ;;  %s1586_s15 = smov %s1364_s16 }
 0x252   : > { %p11_p0 = scmp.ge.s32.totalorder %s14_s21, 6   ;;  %s1587_s16 = smov %s1463_s28 }
 0x253   : > { %s1588_s17 = smov %s1376_s19  ;;  %s1589_s18 = smov %s1380_s20 }
 0x254   : > { %s1590_s19 = smov %s1593_s22  ;;  %s1591_s20 = smov %s1597_s23 }
 0x255   :  { %13 = sbr.rel (!%p11_p0) target bundleno = 4 (0x4), region = 123 }

// kernel: graph_encoder_forward.5
= control target key start
LH: loop header
LB: loop body
LE: loop exit
PB: predicated region body
PF: predicated region fallthrough
CT: control target
= control target key end

     0   :  { %v494_v2 = vmov 0.0|0.0   ;;  %v70_v10 = vlaneseq  ;;  %v495_v14 = vmov 1966171168   ;;  %s646_s0 = inlined_call_operand.vmem [shape: bf16[2,256], index: 0, kind: input, shape index: {}]   ;;  %s647_s1 = inlined_call_operand.vmem [shape: bf16[256,128], index: 1, kind: input, shape index: {}]   ;;  %s648_s2 = inlined_call_operand.vmem [shape: f32[128,128], index: 2, kind: input, shape index: {}]   ;;  %s649_s3 = inlined_call_operand.vmem [shape: f32[1,128], index: 3, kind: input, shape index: {}]   ;;  %s650_s4 = inlined_call_operand.hbm [shape: f32[2,128], index: 4, kind: output, shape index: {}]  }
   0x1   :  { %v454_v0 = vld [vmem:[%s647_s1 + $0x40] sm:$0xff]   ;;  %425 = vmatprep.subr.bf16.mxu1 %v494_v2  ;;  %v456_v3 = vld [vmem:[%s647_s1 + $0x48] sm:$0xff]   ;;  %v458_v5 = vld [vmem:[%s647_s1 + $0x50] sm:$0xff]   ;;  %v68_v15 = vunpack.c.l.s4 %v495_v14 }
   0x2   :  { %v455_v1 = vld [vmem:[%s647_s1] sm:$0xff]   ;;  %351 = vmatprep.subr.bf16.mxu0 %v454_v0  ;;  %v457_v4 = vld [vmem:[%s647_s1 + $0x8] sm:$0xff]   ;;  %v459_v6 = vld [vmem:[%s647_s1 + $0x10] sm:$0xff]   ;;  %v71_v16 = vshrl.u32 %v70_v10, 7 }
   0x3   :  { %352 = vmatpush3.bf16.msra.mxu0 %v455_v1  ;;  %v460_v7 = vld [vmem:[%s647_s1 + $0x58] sm:$0xff]   ;;  %v462_v9 = vld [vmem:[%s647_s1 + $0x60] sm:$0xff]   ;;  %v464_v12 = vld [vmem:[%s647_s1 + $0x68] sm:$0xff]   ;;  %v69_v24 = vunpack.c.0.s8 %v68_v15 }
   0x4   :  { %353 = vmatprep.subr.bf16.mxu0 %v456_v3  ;;  %v461_v8 = vld [vmem:[%s647_s1 + $0x18] sm:$0xff]   ;;  %v463_v11 = vld [vmem:[%s647_s1 + $0x20] sm:$0xff]   ;;  %v226_v18 = vld [vmem:[%s648_s2 + $0x8] sm:$0xff] }
   0x5   :  { %v333_v13 = vld.sshfl [vmem:[%s646_s0] sm:$0x11 pattern:$0x75316420]  ;;  %v227_v19 = vld [vmem:[%s648_s2 + $0x10] sm:$0xff]  ;;  %v228_v21 = vld [vmem:[%s648_s2 + $0x18] sm:$0xff] }
   0x6   :  { %v225_v17 = vld [vmem:[%s648_s2] sm:$0xff]  ;;  %v465_v22 = vld [vmem:[%s647_s1 + $0x28] sm:$0xff]   ;;  %v66_v23 = vcombine.high %v333_v13, %v333_v13  ;;  %v466_v25 = vld [vmem:[%s647_s1 + $0x70] sm:$0xff]   ;;  %v429_v26 = vpack.c.bf16 %v228_v21, %v227_v19 }
   0x7   :  { %354 = vmatpush3.bf16.msra.mxu0 %v457_v4  ;;  %v426_v20 = vpack.c.bf16 %v226_v18, %v225_v17 }
   0x8   :  { %355 = vmatprep.subr.bf16.mxu0 %v458_v5 }
   0x9   :  { %427 = vmatpush3.bf16.msra.mxu1 %v426_v20 }
   0xb   :  { %356 = vmatpush3.bf16.msra.mxu0 %v459_v6 }
   0xc   :  { %357 = vmatprep.subr.bf16.mxu0 %v460_v7 }
   0xf   :  { %358 = vmatpush3.bf16.msra.mxu0 %v461_v8 }
  0x10   :  { %359 = vmatprep.subr.bf16.mxu0 %v462_v9 }
  0x13   :  { %360 = vmatpush3.bf16.msra.mxu0 %v463_v11 }
  0x14   :  { %361 = vmatprep.subr.bf16.mxu0 %v464_v12 }
  0x15   :  { %9 = vsyncpa [#allocation4], 0  ;;  %v72_v27 = vsub.s32 %v69_v24, %v71_v16  ;;  %428 = vmatprep.subr.bf16.mxu1 %v494_v2  ;;  %v229_v28 = vld [vmem:[%s648_s2 + $0x20] sm:$0xff]  ;;  %v230_v29 = vld [vmem:[%s648_s2 + $0x28] sm:$0xff]  ;;  %v496_v42 = vmov 0.0   ;;  %vm497_vm0 = vmmov 0  }
  0x16   :  { %v467_v30 = vld [vmem:[%s647_s1 + $0x30] sm:$0xff]   ;;  %v468_v32 = vld [vmem:[%s647_s1 + $0x78] sm:$0xff]   ;;  %430 = vmatpush3.bf16.msra.mxu1 %v429_v26  ;;  %v432_v33 = vpack.c.bf16 %v230_v29, %v229_v28  ;;  %v233_v38 = vld [vmem:[%s648_s2 + $0x40] sm:$0xff]  ;;  %23 = vst [vmem:[#allocation2] sm:$0x3] %v496_v42  ;;  %422 = vmatprep.mubr.msk.f32.mxu1 %vm497_vm0, %v496_v42 }
  0x17   :  { %362 = vmatpush3.bf16.msra.mxu0 %v465_v22  ;;  %v80_v31 = vrot.slane %v66_v23, %v72_v27  ;;  %431 = vmatprep.subr.bf16.mxu1 %v494_v2  ;;  %v231_v34 = vld [vmem:[%s648_s2 + $0x30] sm:$0xff]  ;;  %v232_v35 = vld [vmem:[%s648_s2 + $0x38] sm:$0xff]  ;;  %v234_v39 = vld [vmem:[%s648_s2 + $0x48] sm:$0xff]  ;;  %v73_v40 = vrot.slane %v333_v13, %v72_v27 }
  0x18   :  { %363 = vmatprep.subr.bf16.mxu0 %v466_v25  ;;  %v469_v36 = vld [vmem:[%s647_s1 + $0x38] sm:$0xff]   ;;  %v435_v37 = vpack.c.bf16 %v232_v35, %v231_v34  ;;  %v438_v41 = vpack.c.bf16 %v234_v39, %v233_v38  ;;  %v235_v43 = vld [vmem:[%s648_s2 + $0x50] sm:$0xff]  ;;  %v237_v46 = vld [vmem:[%s648_s2 + $0x60] sm:$0xff] }
  0x19   :  { %211 = vmatprep.mubr.bf16.mxu0 %v80_v31  ;;  %v236_v44 = vld [vmem:[%s648_s2 + $0x58] sm:$0xff]  ;;  %v238_v47 = vld [vmem:[%s648_s2 + $0x68] sm:$0xff]  ;;  %v239_v49 = vld [vmem:[%s648_s2 + $0x70] sm:$0xff] }
  0x1a   :  { %433 = vmatpush3.bf16.msra.mxu1 %v432_v33  ;;  %v441_v45 = vpack.c.bf16 %v236_v44, %v235_v43  ;;  %v444_v48 = vpack.c.bf16 %v238_v47, %v237_v46  ;;  %v240_v50 = vld [vmem:[%s648_s2 + $0x78] sm:$0xff]  ;;  %v350_v60 = vld [vmem:[%s649_s3] ss:$0 sm:$0xff]  ;;  %s498_s2 = smov [#allocation3]  }
  0x1b   :  { %364 = vmatpush3.bf16.msra.mxu0 %v467_v30  ;;  %434 = vmatprep.subr.bf16.mxu1 %v494_v2  ;;  %v447_v51 = vpack.c.bf16 %v240_v50, %v239_v49  ;;  %s325_s28 = sshll.u32 %s498_s2, 4  ;;  %s326_s28 = int_to_ptr.vmem [resolvable:$true] %s325_s28 }
  0x1c   :  { %365 = vmatprep.subr.bf16.mxu0 %v468_v32  ;;  %s470_s29 = scalar_lea.vmem %s326_s28, 32  ;;  %p475_p1 = scmp.lt.s32.totalorder %s326_s28, %s326_s28 }
  0x1d   :  { %v24_v54 = vld [vmem:[#allocation2] sm:$0x3]  ;;  %p471_p0 = scmp.ne.s32.totalorder %s326_s28, %s470_s29  ;;  %p476_p2 = scmp.lt.s32.totalorder %s470_s29, %s470_s29 }
  0x1e   :  { %436 = vmatpush3.bf16.msra.mxu1 %v435_v37 }
  0x1f   :  { %366 = vmatpush3.bf16.msra.mxu0 %v469_v36  ;;  %437 = vmatprep.subr.bf16.mxu1 %v494_v2  ;;  %p477_p3 = por %p476_p2, %p475_p1 }
  0x21   :  { %p478_p4 = pnand %p477_p3, %p471_p0 }
  0x22   :  { %212 = vmatmul.mubr.bf16.vlgmr.msra.gmra.mrb[0].mxu0 %v73_v40  ;;  %439 = vmatpush3.bf16.msra.mxu1 %v438_v41 }
  0x23   :  { %440 = vmatprep.subr.bf16.mxu1 %v494_v2 }
  0x26   :  { %442 = vmatpush3.bf16.msra.mxu1 %v441_v45 }
  0x27   :  { %443 = vmatprep.subr.bf16.mxu1 %v494_v2 }
  0x2a   :  { %445 = vmatpush3.bf16.msra.mxu1 %v444_v48 }
  0x2b   :  { %446 = vmatprep.subr.bf16.mxu1 %v494_v2 }
  0x2e   :  { %448 = vmatpush3.bf16.msra.mxu1 %v447_v51 }
  0xf5   :  { %v367_v52 = vpop.f32.mrb[0].mxu0 }
  0xf6   :  { %v368_v53 = vpop.f32.mrb[1].mxu0 }
  0xf7   :  { %v369_v55 = vadd.f32 %v368_v53, %v367_v52  ;;  %v370_v56 = vpop.f32.mrb[2].mxu0 }
  0xf8   :  { %v371_v57 = vpop.f32.mrb[3].mxu0 }
  0xf9   :  { %v219_v58 = vadd.f32 %v369_v55, %v24_v54 }
  0xfb   :  { %220 = vst [vmem:[#allocation2] sm:$0x3] %v219_v58 }
 0x102   :  { %v224_v59 = vld [vmem:[#allocation2] sm:$0x3] }
 0x103   :  { %423 = vmatmul.mubr.f32.vlgmr.msra.gmra.mrb[0].mxu1 %v224_v59 }
 0x1d6   :  { %v314_v61 = vpop.f32.mrb[0].mxu1 }
 0x1d7   :  { %v315_v62 = vadd.f32 %v350_v60, %v314_v61  ;;  %v424_v63 = vpop.f32.mrb[1].mxu1 }
 0x1d9   :  { %318 = vst [vmem:[#allocation3] sm:$0x3] %v315_v62 }
 0x1da   :  { %481 = shalt.err (!%p478_p4)
}
 0x1db   :  { %s482_s6 = scalar_lea.hbm %s650_s4, 32 }
 0x1dc   :  { %p483_p5 = scmp.ne.s32.totalorder %s650_s4, %s482_s6  ;;  %p486_p6 = scmp.lt.u32.totalorder %s482_s6, %s650_s4 }
 0x1de   :  { %p488_p7 = pnand %p486_p6, %p483_p5 }
 0x1e0   :  { %491 = shalt.err (!%p488_p7)
}
 0x1e1   :  { %328 = dma.vmem_to_hbm [thread:$0]  %s326_s28, 32, %s650_s4, [#allocation4]  }
 0x1e2   :  { %492 = dma.done.wait [#allocation4], 32  }
 0x1e3   :  { %493 = vsyncadd [#allocation4], 4294967264 }
 0x1e4   :  { %332 = vsyncpa [#allocation4], 1 }

// kernel: graph_encoder_forward.4
= control target key start
LH: loop header
LB: loop body
LE: loop exit
PB: predicated region body
PF: predicated region fallthrough
CT: control target
= control target key end

     0   :  { %s1793_s18 = smov 0   ;;  %s1795_s19 = smov 0   ;;  %s1996_s0 = inlined_call_operand.vmem [shape: bf16[256,256], index: 0, kind: input, shape index: {}]   ;;  %s1997_s1 = inlined_call_operand.vmem [shape: bf16[256,128], index: 1, kind: input, shape index: {}]   ;;  %s1998_s2 = inlined_call_operand.vmem [shape: bf16[128,128], index: 2, kind: input, shape index: {}]   ;;  %s1999_s3 = inlined_call_operand.vmem [shape: bf16[256,128], index: 3, kind: input, shape index: {}]   ;;  %s2000_s4 = inlined_call_operand.vmem [shape: bf16[128,128], index: 4, kind: input, shape index: {}]   ;;  %s2001_s5 = inlined_call_operand.vmem [shape: bf16[256,128], index: 5, kind: output, shape index: {}]  }
   0x1   :  { %s1797_s20 = smov 0   ;;  %s1799_s21 = smov 0  }
   0x2   :  { %s1801_s22 = smov 0   ;;  %s1803_s23 = smov 0  }
   0x3   :  { %s1805_s24 = smov 0  }
   0x4 LB: > { %s24_s25 = sadd.s32 1, %s1752_s22  ;;  %s27_s26 = sadd.s32 1, %s1756_s23  ;;  %s1760_s24 = sphi %s1805_s24, %s15_s24   ;;  %s1756_s23 = sphi %s1803_s23, %s2007_s23   ;;  %s1752_s22 = sphi %s1801_s22, %s2006_s22   ;;  %s1748_s21 = sphi %s1799_s21, %s2005_s21   ;;  %s1744_s20 = sphi %s1797_s20, %s2004_s20   ;;  %s1740_s19 = sphi %s1795_s19, %s2003_s19   ;;  %s1736_s18 = sphi %s1793_s18, %s2002_s18  }
   0x5   : > { %p25_p0 = scmp.ge.s32.totalorder %s24_s25, 2  ;;  %p43_p1 = scmp.ne.s32.totalorder %s1740_s19, %s1736_s18 }
   0x6   : > { %p44_p2 = scmp.eq.s32.totalorder %s1760_s24, 0  ;;  %s36_s30 = sadd.s32 1, %s1740_s19 }
   0x7   : > { %s2009_s25 = smov (%p25_p0, %s24_s25), 0  ;;  %s2011_s26 = smov (!%p25_p0, %s27_s26), %s1756_s23 }
   0x8   : > { %p45_p3 = por %p44_p2, %p43_p1  ;;  %p29_p4 = scmp.ge.s32.totalorder %s2011_s26, 2 }
   0x9   : > { %s32_s27 = ssub.s32 %s1752_s22, %s2009_s25  ;;  %p1312_p6 = scmp.ge.s32.totalorder %s1760_s24, 4 }
   0xa   : > { %s2013_s26 = smov (%p29_p4, %s2011_s26), 0 }
   0xb   : > { %s31_s28 = ssub.s32 %s1756_s23, %s2013_s26  ;;  %195 = sbr.rel (%p1312_p6) target bundleno = 34 (0x22), region = 24 }
   0xc   : > { %s33_s29 = sor.u32 %s32_s27, %s31_s28 }
   0xd   : > { %p34_p5 = scmp.eq.s32.totalorder %s33_s29, 0 }
   0xf   : > { %s1844_s6 = scalar_select %p34_p5, %s1740_s19, %s36_s30  }
  0x12   : > { %198 = sbr.rel (!%p45_p3) target bundleno = 34 (0x22), region = 28  ;;  %s200_s7 = sand.u32 (%p45_p3), 1, %s1740_s19  }
  0x13   : > { %s1385_s8 = sshll.u32 (%p45_p3), %s1756_s23, 5  ;;  %s1313_s9 = sshll.u32 (%p45_p3), %s200_s7, 6 }
  0x14   : > { %s205_s10 = sadd.s32 (%p45_p3), %s1752_s22, %s1385_s8  ;;  %s202_s15 = scalar_lea.vmem (%p45_p3), [#allocation3], %s1313_s9 }
  0x15   : > { %s1316_s11 = sshll.u32 (%p45_p3), %s205_s10, 2 }
  0x16   : > { %s1853_s14 = scalar_lea.vmem (%p45_p3), %s1996_s0, %s1316_s11 }
  0x17   : > { %v223_v0 = vld [vmem:[%s1853_s14] sm:$0xf] (%p45_p3)  ;;  %v225_v1 = vld [vmem:[%s1853_s14 + $0x8] sm:$0xf] (%p45_p3)  ;;  %v227_v2 = vld [vmem:[%s1853_s14 + $0x10] sm:$0xf] (%p45_p3) }
  0x18   : > { %224 = vst [vmem:[%s202_s15] sm:$0xf] (%p45_p3), %v223_v0  ;;  %226 = vst [vmem:[%s202_s15 + $0x4] sm:$0xf] (%p45_p3), %v225_v1  ;;  %v229_v3 = vld [vmem:[%s1853_s14 + $0x18] sm:$0xf] (%p45_p3) }
  0x19   : > { %228 = vst [vmem:[%s202_s15 + $0x8] sm:$0xf] %v227_v2  ;;  %v231_v4 = vld [vmem:[%s1853_s14 + $0x20] sm:$0xf]  ;;  %v233_v5 = vld [vmem:[%s1853_s14 + $0x28] sm:$0xf] }
  0x1a   : > { %230 = vst [vmem:[%s202_s15 + $0xc] sm:$0xf] %v229_v3  ;;  %232 = vst [vmem:[%s202_s15 + $0x10] sm:$0xf] %v231_v4  ;;  %v235_v6 = vld [vmem:[%s1853_s14 + $0x30] sm:$0xf] }
  0x1b   : > { %234 = vst [vmem:[%s202_s15 + $0x14] sm:$0xf] %v233_v5  ;;  %v237_v7 = vld [vmem:[%s1853_s14 + $0x38] sm:$0xf]  ;;  %v239_v8 = vld [vmem:[%s1853_s14 + $0x40] sm:$0xf] }
  0x1c   : > { %236 = vst [vmem:[%s202_s15 + $0x18] sm:$0xf] %v235_v6  ;;  %238 = vst [vmem:[%s202_s15 + $0x1c] sm:$0xf] %v237_v7  ;;  %v241_v9 = vld [vmem:[%s1853_s14 + $0x48] sm:$0xf] }
  0x1d   : > { %240 = vst [vmem:[%s202_s15 + $0x20] sm:$0xf] %v239_v8  ;;  %v243_v10 = vld [vmem:[%s1853_s14 + $0x50] sm:$0xf]  ;;  %v245_v11 = vld [vmem:[%s1853_s14 + $0x58] sm:$0xf] }
  0x1e   : > { %242 = vst [vmem:[%s202_s15 + $0x24] sm:$0xf] %v241_v9  ;;  %244 = vst [vmem:[%s202_s15 + $0x28] sm:$0xf] %v243_v10  ;;  %v247_v12 = vld [vmem:[%s1853_s14 + $0x60] sm:$0xf] }
  0x1f   : > { %246 = vst [vmem:[%s202_s15 + $0x2c] sm:$0xf] %v245_v11  ;;  %v249_v13 = vld [vmem:[%s1853_s14 + $0x68] sm:$0xf]  ;;  %v251_v14 = vld [vmem:[%s1853_s14 + $0x70] sm:$0xf] }
  0x20   : > { %248 = vst [vmem:[%s202_s15 + $0x30] sm:$0xf] %v247_v12  ;;  %250 = vst [vmem:[%s202_s15 + $0x34] sm:$0xf] %v249_v13  ;;  %v253_v15 = vld [vmem:[%s1853_s14 + $0x78] sm:$0xf] }
  0x21   : > { %252 = vst [vmem:[%s202_s15 + $0x38] sm:$0xf] %v251_v14  ;;  %254 = vst [vmem:[%s202_s15 + $0x3c] sm:$0xf] %v253_v15 }
  0x22 PF: > { %p1317_p7 = scmp.ge.s32.totalorder %s1760_s24, 1  ;;  %p326_p8 = scmp.lt.s32.totalorder %s1760_s24, 5 }
  0x24   : > { %p327_p9 = pnand %p1317_p7, %p326_p8 }
  0x25   : > { %s333_s16 = sand.u32 (!%p327_p9), 1, %s1736_s18   ;;  %s1319_s17 = sshll.u32 (!%p327_p9), %s1744_s20, 4 }
  0x26   : > { %330 = sbr.rel (%p327_p9) target bundleno = 781 (0x30d), region = 77  ;;  %s1318_s27 = sshll.u32 (!%p327_p9), %s333_s16, 6 }
  0x27   : > { %p372_p10 = scmp.lt.s32.totalorder (!%p327_p9), %s1319_s17, 31  ;;  %s1321_s28 = sshll.u32 (!%p327_p9), %s1748_s21, 4 }
  0x28   : > { %p378_p11 = scmp.lt.s32.totalorder (!%p327_p9), %s1321_s28, 31  ;;  %s1891_s21 = scalar_lea.vmem (!%p327_p9), [#allocation3], %s1318_s27 }
  0x29   : > { %p1325_p12 = scmp.ne.s32.totalorder (!%p327_p9), %s1744_s20, 0 }
  0x2d   : > { %s2015_s17 = smov (!%p372_p10, %s1319_s17), 31  ;;  %s2017_s28 = smov (!%p378_p11, %s1321_s28), 31 }
  0x2e   : > { %s1320_s29 = sshll.u32 %s2015_s17, 2  ;;  %s1322_s9 = sshll.u32 %s2017_s28, 2  ;;  %v1762_v16 = vmov (!%p1325_p12), 0.0  }
  0x2f   : > { %s1879_s8 = scalar_lea.vmem %s1997_s1, %s1320_s29  ;;  %s1884_s12 = scalar_lea.vmem %s1999_s3, %s1322_s9  ;;  %394 = vst [vmem:[#allocation2] sm:$0xff] (!%p1325_p12), %v1762_v16  ;;  %395 = vst [vmem:[#allocation2 + $0x8] sm:$0xff] (!%p1325_p12), %v1762_v16 }
  0x30   : > { %s1889_s14 = scalar_lea.vmem %s2001_s5, %s1322_s9  ;;  %393 = sbr.rel (%p1325_p12) target bundleno = 55 (0x37), region = 85  ;;  %396 = vst [vmem:[#allocation2 + $0x10] sm:$0xff] (!%p1325_p12), %v1762_v16  ;;  %397 = vst [vmem:[#allocation2 + $0x18] sm:$0xff] (!%p1325_p12), %v1762_v16 }
  0x31   : > { %398 = vst [vmem:[#allocation2 + $0x20] sm:$0xff] (!%p1325_p12), %v1762_v16  ;;  %399 = vst [vmem:[#allocation2 + $0x28] sm:$0xff] (!%p1325_p12), %v1762_v16 }
  0x32   : > { %400 = vst [vmem:[#allocation2 + $0x30] sm:$0xff] (!%p1325_p12), %v1762_v16  ;;  %401 = vst [vmem:[#allocation2 + $0x38] sm:$0xff] (!%p1325_p12), %v1762_v16 }
  0x33   : > { %402 = vst [vmem:[#allocation2 + $0x40] sm:$0xff] (!%p1325_p12), %v1762_v16  ;;  %403 = vst [vmem:[#allocation2 + $0x48] sm:$0xff] (!%p1325_p12), %v1762_v16 }
  0x34   : > { %404 = vst [vmem:[#allocation2 + $0x50] sm:$0xff] (!%p1325_p12), %v1762_v16  ;;  %405 = vst [vmem:[#allocation2 + $0x58] sm:$0xff] (!%p1325_p12), %v1762_v16 }
  0x35   : > { %406 = vst [vmem:[#allocation2 + $0x60] sm:$0xff] (!%p1325_p12), %v1762_v16  ;;  %407 = vst [vmem:[#allocation2 + $0x68] sm:$0xff] (!%p1325_p12), %v1762_v16 }
  0x36   : > { %408 = vst [vmem:[#allocation2 + $0x70] sm:$0xff] (!%p1325_p12), %v1762_v16  ;;  %409 = vst [vmem:[#allocation2 + $0x78] sm:$0xff] (!%p1325_p12), %v1762_v16 }
  0x37 PF: > { %v1666_v17 = vld [vmem:[%s1998_s2] sm:$0xff]   ;;  %v1667_v18 = vld [vmem:[%s1998_s2 + $0x8] sm:$0xff]   ;;  %v1668_v19 = vld [vmem:[%s1998_s2 + $0x10] sm:$0xff]   ;;  %p1350_p13 = scmp.ne.s32.totalorder %s1744_s20, 1 }
  0x38   : > { %1497 = vmatprep.subr.bf16.mxu0 %v1666_v17  ;;  %v1669_v20 = vld [vmem:[%s1998_s2 + $0x18] sm:$0xff]   ;;  %v1674_v21 = vld [vmem:[%s1879_s8] sm:$0xff]   ;;  %v1671_v23 = vld [vmem:[%s1998_s2 + $0x28] sm:$0xff]  }
  0x39   : > { %1498 = vmatpush3.bf16.msra.mxu0 %v1666_v17  ;;  %1513 = vmatprep.mubr.bf16.mxu0 %v1674_v21  ;;  %v1670_v22 = vld [vmem:[%s1998_s2 + $0x20] sm:$0xff]   ;;  %v1672_v24 = vld [vmem:[%s1998_s2 + $0x30] sm:$0xff]   ;;  %v1673_v25 = vld [vmem:[%s1998_s2 + $0x38] sm:$0xff]  }
  0x3a   : > { %1499 = vmatprep.subr.bf16.mxu0 %v1667_v18  ;;  %v1675_v26 = vld [vmem:[%s1879_s8 + $0x8] sm:$0xff]   ;;  %v1676_v27 = vld [vmem:[%s1879_s8 + $0x10] sm:$0xff]   ;;  %v1677_v28 = vld [vmem:[%s1879_s8 + $0x18] sm:$0xff]  }
  0x3b   : > { %v1678_v29 = vld [vmem:[%s1879_s8 + $0x20] sm:$0xff]   ;;  %v1679_v30 = vld [vmem:[%s1879_s8 + $0x28] sm:$0xff]   ;;  %v1680_v31 = vld [vmem:[%s1879_s8 + $0x30] sm:$0xff]  }
  0x3c   : > { %v1681_v32 = vld [vmem:[%s1879_s8 + $0x38] sm:$0xff]   ;;  %v1682_v33 = vld [vmem:[%s1891_s21] sm:$0xff]   ;;  %v1683_v58 = vld [vmem:[%s1891_s21 + $0x8] sm:$0xff]  }
  0x3d   : > { %1500 = vmatpush3.bf16.msra.mxu0 %v1667_v18  ;;  %1545 = vmatprep.mubr.bf16.mxu1 %v1682_v33  ;;  %v1684_v59 = vld [vmem:[%s1891_s21 + $0x10] sm:$0xff]   ;;  %v1685_v60 = vld [vmem:[%s1891_s21 + $0x18] sm:$0xff]   ;;  %v1686_v61 = vld [vmem:[%s1891_s21 + $0x20] sm:$0xff]  }
  0x3e   : > { %1501 = vmatprep.subr.bf16.mxu0 %v1668_v19  ;;  %v1687_v62 = vld [vmem:[%s1891_s21 + $0x28] sm:$0xff]   ;;  %v1688_v63 = vld [vmem:[%s1891_s21 + $0x30] sm:$0xff]   ;;  %v1689_v0 = vld [vmem:[%s1891_s21 + $0x38] sm:$0xff]  }
  0x3f   : > { %v637_v1 = vld [vmem:[#allocation2 + $0x10] sm:$0xff]  ;;  %v635_v2 = vld [vmem:[#allocation2] sm:$0xff]  ;;  %v638_v4 = vld [vmem:[#allocation2 + $0x18] sm:$0xff] }
  0x40   : > { %v636_v7 = vld [vmem:[#allocation2 + $0x8] sm:$0xff]  ;;  %v641_v13 = vld [vmem:[#allocation2 + $0x30] sm:$0xff]  ;;  %v639_v14 = vld [vmem:[#allocation2 + $0x20] sm:$0xff] }
  0x41   : > { %1502 = vmatpush3.bf16.msra.mxu0 %v1668_v19  ;;  %v642_v16 = vld [vmem:[#allocation2 + $0x38] sm:$0xff]  ;;  %v640_v19 = vld [vmem:[#allocation2 + $0x28] sm:$0xff] }
  0x42   : > { %1503 = vmatprep.subr.bf16.mxu0 %v1669_v20 }
  0x45   : > { %1504 = vmatpush3.bf16.msra.mxu0 %v1669_v20 }
  0x46   : > { %1505 = vmatprep.subr.bf16.mxu0 %v1670_v22 }
  0x49   : > { %1506 = vmatpush3.bf16.msra.mxu0 %v1670_v22 }
  0x4a   : > { %1507 = vmatprep.subr.bf16.mxu0 %v1671_v23 }
  0x4d   : > { %1508 = vmatpush3.bf16.msra.mxu0 %v1671_v23 }
  0x4e   : > { %1509 = vmatprep.subr.bf16.mxu0 %v1672_v24 }
  0x51   : > { %1510 = vmatpush3.bf16.msra.mxu0 %v1672_v24 }
  0x52   : > { %1511 = vmatprep.subr.bf16.mxu0 %v1673_v25 }
  0x55   : > { %1512 = vmatpush3.bf16.msra.mxu0 %v1673_v25  ;;  %v645_v25 = vld [vmem:[#allocation2 + $0x50] sm:$0xff] }
  0x58   : > { %1514 = vmatmul.mubr.bf16.vlgmr.msra.gmra.mrb[0].mxu0 %v1675_v26  ;;  %v643_v26 = vld [vmem:[#allocation2 + $0x40] sm:$0xff] }
  0x59   : > { %1517 = vmatprep.mubr.bf16.mxu0 %v1676_v27 }
  0x60   : > { %1518 = vmatmul.mubr.bf16.gmra.mrb[4].mxu0 %v1677_v28  ;;  %v646_v28 = vld [vmem:[#allocation2 + $0x58] sm:$0xff] }
  0x61   : > { %1521 = vmatprep.mubr.bf16.mxu0 %v1678_v29 }
  0x68   : > { %1522 = vmatmul.mubr.bf16.gmra.mrb[8].mxu0 %v1679_v30 }
  0x69   : > { %1525 = vmatprep.mubr.bf16.mxu0 %v1680_v31  ;;  %v644_v31 = vld [vmem:[#allocation2 + $0x48] sm:$0xff] }
  0x70   : > { %1526 = vmatmul.mubr.bf16.gmra.mrb[12].mxu0 %v1681_v32 }
 0x12b   : > { %v1515_v34 = vpop.f32.mrb[0].mxu0 }
 0x12c   : > { %v572_v35 = vpop.f32.mrb[1].mxu0 }
 0x12d   : > { %v1516_v36 = vpop.f32.mrb[2].mxu0 }
 0x12e   : > { %v668_v37 = vpack.c.bf16 %v1516_v36, %v1515_v34  ;;  %v575_v38 = vpop.f32.mrb[3].mxu0 }
 0x12f   : > { %v667_v39 = vpack.c.bf16 %v575_v38, %v572_v35  ;;  %v647_v38 = vld [vmem:[#allocation2 + $0x60] sm:$0xff] }
 0x131   : > { %1529 = vmatprep.subr.bf16.mxu1 %v667_v39 }
 0x132   : > { %1530 = vmatpush3.bf16.msra.mxu1 %v667_v39 }
 0x133   : > { %v1519_v40 = vpop.f32.mrb[4].mxu0  ;;  %1531 = vmatprep.subr.bf16.mxu1 %v668_v37 }
 0x134   : > { %v588_v41 = vpop.f32.mrb[5].mxu0 }
 0x135   : > { %v1520_v42 = vpop.f32.mrb[6].mxu0 }
 0x136   : > { %v670_v43 = vpack.c.bf16 %v1520_v42, %v1519_v40  ;;  %v591_v44 = vpop.f32.mrb[7].mxu0  ;;  %1532 = vmatpush3.bf16.msra.mxu1 %v668_v37  ;;  %v649_v37 = vld [vmem:[#allocation2 + $0x70] sm:$0xff]  ;;  %v650_v40 = vld [vmem:[#allocation2 + $0x78] sm:$0xff] }
 0x137   : > { %v669_v45 = vpack.c.bf16 %v591_v44, %v588_v41 }
 0x139   : > { %1533 = vmatprep.subr.bf16.mxu1 %v669_v45 }
 0x13a   : > { %1534 = vmatpush3.bf16.msra.mxu1 %v669_v45 }
 0x13b   : > { %v1523_v46 = vpop.f32.mrb[8].mxu0  ;;  %1535 = vmatprep.subr.bf16.mxu1 %v670_v43 }
 0x13c   : > { %v604_v47 = vpop.f32.mrb[9].mxu0 }
 0x13d   : > { %v1524_v48 = vpop.f32.mrb[10].mxu0 }
 0x13e   : > { %v672_v49 = vpack.c.bf16 %v1524_v48, %v1523_v46  ;;  %v607_v50 = vpop.f32.mrb[11].mxu0  ;;  %1536 = vmatpush3.bf16.msra.mxu1 %v670_v43  ;;  %v648_v43 = vld [vmem:[#allocation2 + $0x68] sm:$0xff] }
 0x13f   : > { %v671_v51 = vpack.c.bf16 %v607_v50, %v604_v47  ;;  %v1691_v50 = vld [vmem:[%s2000_s4 + $0x8] sm:$0xff] (!%p1350_p13)  }
 0x141   : > { %1537 = vmatprep.subr.bf16.mxu1 %v671_v51 }
 0x142   : > { %1538 = vmatpush3.bf16.msra.mxu1 %v671_v51  ;;  %v1692_v51 = vld [vmem:[%s2000_s4 + $0x10] sm:$0xff] (!%p1350_p13)  }
 0x143   : > { %v1527_v52 = vpop.f32.mrb[12].mxu0  ;;  %1539 = vmatprep.subr.bf16.mxu1 %v672_v49 }
 0x144   : > { %v620_v53 = vpop.f32.mrb[13].mxu0 }
 0x145   : > { %v1528_v54 = vpop.f32.mrb[14].mxu0 }
 0x146   : > { %v674_v55 = vpack.c.bf16 %v1528_v54, %v1527_v52  ;;  %v623_v56 = vpop.f32.mrb[15].mxu0  ;;  %1540 = vmatpush3.bf16.msra.mxu1 %v672_v49  ;;  %v1690_v49 = vld [vmem:[%s2000_s4] sm:$0xff] (!%p1350_p13)   ;;  %v1693_v52 = vld [vmem:[%s2000_s4 + $0x18] sm:$0xff] (!%p1350_p13)  }
 0x147   : > { %v673_v57 = vpack.c.bf16 %v623_v56, %v620_v53  ;;  %1561 = vmatprep.subr.bf16.mxu0 (!%p1350_p13), %v1690_v49  ;;  %v1698_v53 = vld [vmem:[%s1884_s12] sm:$0xff] (!%p1350_p13)   ;;  %v1695_v56 = vld [vmem:[%s2000_s4 + $0x28] sm:$0xff] (!%p1350_p13)  }
 0x148   : > { %1562 = vmatpush3.bf16.msra.mxu0 (!%p1350_p13), %v1690_v49  ;;  %v1699_v54 = vld [vmem:[%s1884_s12 + $0x20] sm:$0xff] (!%p1350_p13)   ;;  %1577 = vmatprep.mubr.bf16.mxu0 (!%p1350_p13), %v1698_v53 }
 0x149   : > { %1541 = vmatprep.subr.bf16.mxu1 %v673_v57  ;;  %1563 = vmatprep.subr.bf16.mxu0 (!%p1350_p13), %v1691_v50 }
 0x14a   : > { %1542 = vmatpush3.bf16.msra.mxu1 %v673_v57  ;;  %v1696_v57 = vld [vmem:[%s2000_s4 + $0x30] sm:$0xff] (!%p1350_p13)  }
 0x14b   : > { %1543 = vmatprep.subr.bf16.mxu1 %v674_v55 }
 0x14c   : > { %1564 = vmatpush3.bf16.msra.mxu0 (!%p1350_p13), %v1691_v50 }
 0x14d   : > { %1565 = vmatprep.subr.bf16.mxu0 (!%p1350_p13), %v1692_v51 }
 0x14e   : > { %1544 = vmatpush3.bf16.msra.mxu1 %v674_v55  ;;  %v1694_v55 = vld [vmem:[%s2000_s4 + $0x20] sm:$0xff] (!%p1350_p13)  }
 0x14f   : > { %1593 = vmatprep.subr.bf16.mxu1 (!%p1350_p13), %v1690_v49 }
 0x150   : > { %1566 = vmatpush3.bf16.msra.mxu0 (!%p1350_p13), %v1692_v51 }
 0x151   : > { %1546 = vmatmul.mubr.bf16.vlgmr.msra.gmra.mrb[0].mxu1 %v1683_v58  ;;  %1567 = vmatprep.subr.bf16.mxu0 (!%p1350_p13), %v1693_v52  ;;  %v1697_v58 = vld [vmem:[%s2000_s4 + $0x38] sm:$0xff] (!%p1350_p13)  }
 0x152   : > { %1549 = vmatprep.mubr.bf16.mxu1 %v1684_v59  ;;  %1601 = vmatpush3.bf16.msra.mxu1 (!%p1350_p13), %v1690_v49  ;;  %v1700_v59 = vld [vmem:[%s1884_s12 + $0x8] sm:$0xff] (!%p1350_p13)  }
 0x153   : > { %1594 = vmatprep.subr.bf16.mxu1 (!%p1350_p13), %v1691_v50 }
 0x154   : > { %1568 = vmatpush3.bf16.msra.mxu0 (!%p1350_p13), %v1693_v52 }
 0x155   : > { %1569 = vmatprep.subr.bf16.mxu0 (!%p1350_p13), %v1694_v55 }
 0x156   : > { %1602 = vmatpush3.bf16.msra.mxu1 (!%p1350_p13), %v1691_v50 }
 0x157   : > { %1595 = vmatprep.subr.bf16.mxu1 (!%p1350_p13), %v1692_v51 }
 0x158   : > { %1570 = vmatpush3.bf16.msra.mxu0 (!%p1350_p13), %v1694_v55 }
 0x159   : > { %1550 = vmatmul.mubr.bf16.gmra.mrb[4].mxu1 %v1685_v60  ;;  %1571 = vmatprep.subr.bf16.mxu0 (!%p1350_p13), %v1695_v56  ;;  %v1701_v60 = vld [vmem:[%s1884_s12 + $0x28] sm:$0xff] (!%p1350_p13)  }
 0x15a   : > { %1553 = vmatprep.mubr.bf16.mxu1 %v1686_v61  ;;  %1603 = vmatpush3.bf16.msra.mxu1 (!%p1350_p13), %v1692_v51  ;;  %v1702_v61 = vld [vmem:[%s1884_s12 + $0x10] sm:$0xff] (!%p1350_p13)  }
 0x15b   : > { %1596 = vmatprep.subr.bf16.mxu1 (!%p1350_p13), %v1693_v52 }
 0x15c   : > { %1572 = vmatpush3.bf16.msra.mxu0 (!%p1350_p13), %v1695_v56 }
 0x15d   : > { %1573 = vmatprep.subr.bf16.mxu0 (!%p1350_p13), %v1696_v57 }
 0x15e   : > { %1604 = vmatpush3.bf16.msra.mxu1 (!%p1350_p13), %v1693_v52 }
 0x15f   : > { %1597 = vmatprep.subr.bf16.mxu1 (!%p1350_p13), %v1694_v55 }
 0x160   : > { %1574 = vmatpush3.bf16.msra.mxu0 (!%p1350_p13), %v1696_v57 }
 0x161   : > { %1554 = vmatmul.mubr.bf16.gmra.mrb[8].mxu1 %v1687_v62  ;;  %1575 = vmatprep.subr.bf16.mxu0 (!%p1350_p13), %v1697_v58  ;;  %v1703_v62 = vld [vmem:[%s1884_s12 + $0x30] sm:$0xff] (!%p1350_p13)  }
 0x162   : > { %1557 = vmatprep.mubr.bf16.mxu1 %v1688_v63  ;;  %1605 = vmatpush3.bf16.msra.mxu1 (!%p1350_p13), %v1694_v55  ;;  %v1704_v63 = vld [vmem:[%s1884_s12 + $0x18] sm:$0xff] (!%p1350_p13)  }
 0x163   : > { %1598 = vmatprep.subr.bf16.mxu1 (!%p1350_p13), %v1695_v56 }
 0x164   : > { %1576 = vmatpush3.bf16.msra.mxu0 (!%p1350_p13), %v1697_v58 }
 0x166   : > { %1606 = vmatpush3.bf16.msra.mxu1 (!%p1350_p13), %v1695_v56 }
 0x167   : > { %1599 = vmatprep.subr.bf16.mxu1 (!%p1350_p13), %v1696_v57  ;;  %1578 = vmatmul.mubr.bf16.vlgmr.msra.gmra.mrb[0].mxu0 (!%p1350_p13), %v1700_v59 }
 0x168   : > { %1581 = vmatprep.mubr.bf16.mxu0 (!%p1350_p13), %v1702_v61 }
 0x169   : > { %1558 = vmatmul.mubr.bf16.gmra.mrb[12].mxu1 %v1689_v0  ;;  %v1705_v0 = vld [vmem:[%s1884_s12 + $0x38] sm:$0xff] (!%p1350_p13)  }
 0x16a   : > { %1585 = vmatprep.mubr.bf16.mxu1 (!%p1350_p13), %v1699_v54  ;;  %1607 = vmatpush3.bf16.msra.mxu1 (!%p1350_p13), %v1696_v57 }
 0x16b   : > { %1600 = vmatprep.subr.bf16.mxu1 (!%p1350_p13), %v1697_v58 }
 0x16e   : > { %1608 = vmatpush3.bf16.msra.mxu1 (!%p1350_p13), %v1697_v58 }
 0x16f   : > { %1582 = vmatmul.mubr.bf16.gmra.mrb[4].mxu0 (!%p1350_p13), %v1704_v63 }
 0x224   : > { %v1547_v3 = vpop.f32.mrb[0].mxu1 }
 0x225   : > { %v822_v5 = vadd.f32 %v1547_v3, %v637_v1  ;;  %v757_v6 = vpop.f32.mrb[1].mxu1 }
 0x226   : > { %v820_v8 = vadd.f32 %v757_v6, %v635_v2  ;;  %v1548_v9 = vpop.f32.mrb[2].mxu1 }
 0x227   : > { %838 = vst [vmem:[#allocation2 + $0x10] sm:$0xff] %v822_v5  ;;  %v823_v10 = vadd.f32 %v1548_v9, %v638_v4  ;;  %v760_v11 = vpop.f32.mrb[3].mxu1  ;;  %1586 = vmatmul.mubr.bf16.vlgmr.msra.gmra.mrb[0].mxu1 (!%p1350_p13), %v1701_v60 }
 0x228   : > { %836 = vst [vmem:[#allocation2] sm:$0xff] %v820_v8  ;;  %v821_v12 = vadd.f32 %v760_v11, %v636_v7  ;;  %1589 = vmatprep.mubr.bf16.mxu1 (!%p1350_p13), %v1703_v62 }
 0x229   : > { %839 = vst [vmem:[#allocation2 + $0x18] sm:$0xff] %v823_v10 }
 0x22a   : > { %837 = vst [vmem:[#allocation2 + $0x8] sm:$0xff] %v821_v12 }
 0x22c   : > { %v1551_v15 = vpop.f32.mrb[4].mxu1 }
 0x22d   : > { %v826_v17 = vadd.f32 %v1551_v15, %v641_v13  ;;  %v773_v18 = vpop.f32.mrb[5].mxu1 }
 0x22e   : > { %v824_v20 = vadd.f32 %v773_v18, %v639_v14  ;;  %v1552_v21 = vpop.f32.mrb[6].mxu1  ;;  %v1083_v1 = vld [vmem:[#allocation2 + $0x10] sm:$0xff] (!%p1350_p13) }
 0x22f   : > { %842 = vst [vmem:[#allocation2 + $0x30] sm:$0xff] %v826_v17  ;;  %v827_v22 = vadd.f32 %v1552_v21, %v642_v16  ;;  %v776_v23 = vpop.f32.mrb[7].mxu1  ;;  %1590 = vmatmul.mubr.bf16.gmra.mrb[4].mxu1 (!%p1350_p13), %v1705_v0  ;;  %v1081_v3 = vld [vmem:[#allocation2] sm:$0xff] (!%p1350_p13) }
 0x230   : > { %840 = vst [vmem:[#allocation2 + $0x20] sm:$0xff] %v824_v20  ;;  %v825_v24 = vadd.f32 %v776_v23, %v640_v19  ;;  %v1084_v7 = vld [vmem:[#allocation2 + $0x18] sm:$0xff] (!%p1350_p13) }
 0x231   : > { %843 = vst [vmem:[#allocation2 + $0x38] sm:$0xff] %v827_v22  ;;  %v1082_v13 = vld [vmem:[#allocation2 + $0x8] sm:$0xff] (!%p1350_p13) }
 0x232   : > { %841 = vst [vmem:[#allocation2 + $0x28] sm:$0xff] %v825_v24 }
 0x234   : > { %v1555_v27 = vpop.f32.mrb[8].mxu1 }
 0x235   : > { %v830_v29 = vadd.f32 %v1555_v27, %v645_v25  ;;  %v789_v30 = vpop.f32.mrb[9].mxu1 }
 0x236   : > { %v828_v32 = vadd.f32 %v789_v30, %v643_v26  ;;  %v1556_v33 = vpop.f32.mrb[10].mxu1 }
 0x237   : > { %846 = vst [vmem:[#allocation2 + $0x50] sm:$0xff] %v830_v29  ;;  %v831_v34 = vadd.f32 %v1556_v33, %v646_v28  ;;  %v792_v35 = vpop.f32.mrb[11].mxu1  ;;  %v1087_v33 = vld [vmem:[#allocation2 + $0x30] sm:$0xff] (!%p1350_p13) }
 0x238   : > { %844 = vst [vmem:[#allocation2 + $0x40] sm:$0xff] %v828_v32  ;;  %v829_v36 = vadd.f32 %v792_v35, %v644_v31 }
 0x239   : > { %847 = vst [vmem:[#allocation2 + $0x58] sm:$0xff] %v831_v34  ;;  %v1086_v49 = vld [vmem:[#allocation2 + $0x28] sm:$0xff] (!%p1350_p13) }
 0x23a   : > { %845 = vst [vmem:[#allocation2 + $0x48] sm:$0xff] %v829_v36  ;;  %v1579_v5 = vpop.f32.mrb[0].mxu0 (!%p1350_p13) }
 0x23b   : > { %v1099_v9 = vadd.f32 (!%p1350_p13), %v1579_v5, %v1083_v1  ;;  %v1018_v11 = vpop.f32.mrb[1].mxu0 (!%p1350_p13) }
 0x23c   : > { %v1559_v39 = vpop.f32.mrb[12].mxu1  ;;  %855 = sbr.rel (%p1350_p13) target bundleno = 781 (0x30d), region = 89  ;;  %v1097_v15 = vadd.f32 (!%p1350_p13), %v1081_v3, %v1018_v11  ;;  %v1580_v17 = vpop.f32.mrb[2].mxu0 (!%p1350_p13) }
 0x23d   : > { %v834_v41 = vadd.f32 %v1559_v39, %v649_v37  ;;  %v805_v42 = vpop.f32.mrb[13].mxu1  ;;  %v1100_v19 = vadd.f32 (!%p1350_p13), %v1580_v17, %v1084_v7  ;;  %v1021_v21 = vpop.f32.mrb[3].mxu0 (!%p1350_p13)  ;;  %v1115_v25 = vmax.f32 (!%p1350_p13), %v1099_v9, 0.0  ;;  %v1085_v37 = vld [vmem:[#allocation2 + $0x20] sm:$0xff] (!%p1350_p13) }
 0x23e   : > { %v832_v44 = vadd.f32 %v805_v42, %v647_v38  ;;  %v1560_v45 = vpop.f32.mrb[14].mxu1  ;;  %v1091_v2 = vld [vmem:[#allocation2 + $0x50] sm:$0xff] (!%p1350_p13)  ;;  %v1098_v23 = vadd.f32 (!%p1350_p13), %v1082_v13, %v1021_v21  ;;  %v1113_v29 = vmax.f32 (!%p1350_p13), %v1097_v15, 0.0 }
 0x23f   : > { %850 = vst [vmem:[#allocation2 + $0x70] sm:$0xff] %v834_v41  ;;  %v835_v46 = vadd.f32 %v1560_v45, %v650_v40  ;;  %v808_v47 = vpop.f32.mrb[15].mxu1  ;;  %v1089_v4 = vld [vmem:[#allocation2 + $0x40] sm:$0xff] (!%p1350_p13)  ;;  %v1116_v27 = vmax.f32 (!%p1350_p13), %v1100_v19, 0.0 }
 0x240   : > { %848 = vst [vmem:[#allocation2 + $0x60] sm:$0xff] %v832_v44  ;;  %v833_v48 = vadd.f32 %v808_v47, %v648_v43  ;;  %v1092_v8 = vld [vmem:[#allocation2 + $0x58] sm:$0xff] (!%p1350_p13)  ;;  %v1114_v31 = vmax.f32 (!%p1350_p13), %v1098_v23, 0.0 }
 0x241   : > { %851 = vst [vmem:[#allocation2 + $0x78] sm:$0xff] %v835_v46  ;;  %v1090_v14 = vld [vmem:[#allocation2 + $0x48] sm:$0xff] (!%p1350_p13)  ;;  %v1410_v35 = vpack.c.bf16 (!%p1350_p13), %v1116_v27, %v1115_v25  ;;  %v1088_v43 = vld [vmem:[#allocation2 + $0x38] sm:$0xff] (!%p1350_p13) }
 0x242   : > { %849 = vst [vmem:[#allocation2 + $0x68] sm:$0xff] %v833_v48  ;;  %v1405_v39 = vpack.c.bf16 (!%p1350_p13), %v1114_v31, %v1113_v29  ;;  %v1583_v41 = vpop.f32.mrb[4].mxu0 (!%p1350_p13) }
 0x243   : > { %1442 = vst [vmem:[%s1889_s14 + $0x8] sm:$0xff] %v1410_v35   ;;  %v1103_v45 = vadd.f32 %v1583_v41, %v1087_v33  ;;  %v1034_v47 = vpop.f32.mrb[5].mxu0 }
 0x244   : > { %1406 = vst [vmem:[%s1889_s14] sm:$0xff] %v1405_v39   ;;  %v1101_v51 = vadd.f32 %v1085_v37, %v1034_v47  ;;  %v1584_v53 = vpop.f32.mrb[6].mxu0 }
 0x245   : > { %v1104_v55 = vadd.f32 %v1584_v53, %v1088_v43  ;;  %v1037_v57 = vpop.f32.mrb[7].mxu0  ;;  %v1119_v61 = vmax.f32 %v1103_v45, 0.0 }
 0x246   : > { %v1095_v34 = vld [vmem:[#allocation2 + $0x70] sm:$0xff]  ;;  %v1102_v59 = vadd.f32 %v1086_v49, %v1037_v57  ;;  %v1117_v1 = vmax.f32 %v1101_v51, 0.0 }
 0x247   : > { %v1093_v38 = vld [vmem:[#allocation2 + $0x60] sm:$0xff]  ;;  %v1120_v63 = vmax.f32 %v1104_v55, 0.0 }
 0x248   : > { %v1096_v44 = vld [vmem:[#allocation2 + $0x78] sm:$0xff]  ;;  %v1118_v3 = vmax.f32 %v1102_v59, 0.0 }
 0x249   : > { %v1094_v50 = vld [vmem:[#allocation2 + $0x68] sm:$0xff]  ;;  %v1420_v5 = vpack.c.bf16 %v1120_v63, %v1119_v61 }
 0x24a   : > { %v1415_v7 = vpack.c.bf16 %v1118_v3, %v1117_v1 }
 0x24b   : > { %1444 = vst [vmem:[%s1889_s14 + $0x18] sm:$0xff] %v1420_v5  }
 0x24c   : > { %1443 = vst [vmem:[%s1889_s14 + $0x10] sm:$0xff] %v1415_v7  }
 0x2fa   : > { %v1587_v6 = vpop.f32.mrb[0].mxu1 }
 0x2fb   : > { %v1107_v10 = vadd.f32 %v1587_v6, %v1091_v2  ;;  %v1050_v12 = vpop.f32.mrb[1].mxu1 }
 0x2fc   : > { %v1105_v16 = vadd.f32 %v1089_v4, %v1050_v12  ;;  %v1588_v18 = vpop.f32.mrb[2].mxu1 }
 0x2fd   : > { %v1108_v20 = vadd.f32 %v1588_v18, %v1092_v8  ;;  %v1053_v22 = vpop.f32.mrb[3].mxu1  ;;  %v1123_v26 = vmax.f32 %v1107_v10, 0.0 }
 0x2fe   : > { %v1106_v24 = vadd.f32 %v1090_v14, %v1053_v22  ;;  %v1121_v30 = vmax.f32 %v1105_v16, 0.0 }
 0x2ff   : > { %v1124_v28 = vmax.f32 %v1108_v20, 0.0 }
 0x300   : > { %v1122_v32 = vmax.f32 %v1106_v24, 0.0 }
 0x301   : > { %v1430_v36 = vpack.c.bf16 %v1124_v28, %v1123_v26 }
 0x302   : > { %v1425_v40 = vpack.c.bf16 %v1122_v32, %v1121_v30  ;;  %v1591_v42 = vpop.f32.mrb[4].mxu1 }
 0x303   : > { %1446 = vst [vmem:[%s1889_s14 + $0x28] sm:$0xff] %v1430_v36   ;;  %v1111_v46 = vadd.f32 %v1591_v42, %v1095_v34  ;;  %v1066_v48 = vpop.f32.mrb[5].mxu1 }
 0x304   : > { %1445 = vst [vmem:[%s1889_s14 + $0x20] sm:$0xff] %v1425_v40   ;;  %v1109_v52 = vadd.f32 %v1093_v38, %v1066_v48  ;;  %v1592_v54 = vpop.f32.mrb[6].mxu1 }
 0x305   : > { %v1112_v56 = vadd.f32 %v1592_v54, %v1096_v44  ;;  %v1069_v58 = vpop.f32.mrb[7].mxu1  ;;  %v1127_v62 = vmax.f32 %v1111_v46, 0.0 }
 0x306   : > { %v1110_v60 = vadd.f32 %v1094_v50, %v1069_v58  ;;  %v1125_v2 = vmax.f32 %v1109_v52, 0.0 }
 0x307   : > { %v1128_v0 = vmax.f32 %v1112_v56, 0.0 }
 0x308   : > { %v1126_v4 = vmax.f32 %v1110_v60, 0.0 }
 0x309   : > { %v1440_v6 = vpack.c.bf16 %v1128_v0, %v1127_v62 }
 0x30a   : > { %v1435_v8 = vpack.c.bf16 %v1126_v4, %v1125_v2 }
 0x30b   : > { %1448 = vst [vmem:[%s1889_s14 + $0x38] sm:$0xff] %v1440_v6  }
 0x30c   : > { %1447 = vst [vmem:[%s1889_s14 + $0x30] sm:$0xff] %v1435_v8  }
 0x30d PF: > { %s15_s24 = sadd.s32 1, %s1760_s24   ;;  %s2002_s18 = smov %s1740_s19 }
 0x30e   : > { %p12_p0 = scmp.ge.s32.totalorder %s15_s24, 6   ;;  %s2003_s19 = smov %s1844_s6 }
 0x30f   : > { %s2004_s20 = smov %s1752_s22  ;;  %s2005_s21 = smov %s1756_s23 }
 0x310   : > { %s2006_s22 = smov %s2009_s25  ;;  %s2007_s23 = smov %s2013_s26 }
 0x311   :  { %14 = sbr.rel (!%p12_p0) target bundleno = 4 (0x4), region = 130 }

</bundles_post_ra>
